<compile_context>
chip_gen: v6e
topology: v6e:2x2x1
jax: 0.10.0
libtpu: 0.0.40
codegen_flags: <defaults>
</compile_context>

<pallas_src>
import math
import numpy as np
import jax
import jax.numpy as jnp
from jax.experimental import pallas as pl
from jax.experimental.pallas import tpu as pltpu


# ----------------------------------------------------------------------------
# host-side constant builders (mirror the PyTorch buffer construction exactly)
# ----------------------------------------------------------------------------
def make_axial_pos(h, w):
    h_pos = np.linspace(-1.0, 1.0, h + 1)
    w_pos = np.linspace(-1.0, 1.0, w + 1)
    h_pos = (h_pos[:-1] + h_pos[1:]) / 2
    w_pos = (w_pos[:-1] + w_pos[1:]) / 2
    hh, ww = np.meshgrid(h_pos, w_pos, indexing="ij")
    return np.stack([hh, ww], axis=-1).reshape(h * w, 2)


def make_axial_pos_multiscale(sizes):
    d = len(sizes)
    poses = []
    for i, size in enumerate(sizes):
        pa = make_axial_pos(size, size)
        pr = np.full((pa.shape[0], 1), i / (d - 1))
        poses.append(np.concatenate([pa, pr], axis=-1))
    return np.concatenate(poses, axis=0)


def make_block_causal_mask(lengths):
    n = sum(lengths)
    m = np.zeros((n, n), dtype=np.float32)
    i = 0
    for L in lengths:
        m[i:, i : i + L] = 1.0
        i += L
    return m


def make_theta(sizes, head_dim, n_heads):
    hd8 = head_dim // 8
    freqs = np.exp(
        np.linspace(math.log(math.pi), math.log(10 * math.pi), hd8 * n_heads + 1)[:-1]
    )
    freqs = freqs.reshape(hd8, n_heads).T          # (n_heads, head_dim//8)
    pos = make_axial_pos_multiscale(sizes)         # (total, 3)
    th = pos[:, None, 0:1] * freqs
    tw = pos[:, None, 1:2] * freqs
    td = pos[:, None, 2:3] * freqs
    return np.concatenate([th, tw, td], axis=-1)   # (total, n_heads, 3*hd//8)


# ----------------------------------------------------------------------------
# one-time host-side preprocessing (hoisted out of the per-call forward)
# ----------------------------------------------------------------------------
def prepare_inputs(params, sizes, head_dim):
    bf = jnp.bfloat16
    emb = params["emb"]
    V, D = emb.shape
    hd = head_dim
    nh = D // hd
    d = 3 * (hd // 8)                          # rotated half-width of the head dim
    S = params["pos_embed"].shape[0]

    # fold the 1/sqrt(hd) attention scale into the q columns of the qkv projection
    qkvw = params["qkvw"].at[:, :, :D].multiply(hd ** -0.5)
    qkvb = params["qkvb"].at[:, :, :D].multiply(hd ** -0.5)

    # full-width RoPE tables (nh, S, hd); sign of the rotation folded into sin
    theta = make_theta(sizes, hd, nh)[:S].transpose(1, 0, 2)       # (nh, S, d)
    cos = np.cos(theta)
    sin = np.sin(theta)
    ones = np.ones((nh, S, hd - 2 * d), np.float32)
    cosf = np.concatenate([cos, cos, ones], axis=-1).astype(np.float32)
    sinf = np.concatenate([-sin, sin, 0.0 * ones], axis=-1).astype(np.float32)

    # additive block-causal mask (0 / -1e30); scores stay f32 so -1e30 is safe
    mask = make_block_causal_mask(tuple(sz * sz for sz in sizes))[:S, :S]
    mask_bias = np.where(mask > 0.5, 0.0, -1e30).astype(np.float32)

    # lane-dense tied output head: vocab padded to a multiple of 128, bf16, transposed
    V_pad = max(128, ((V + 127) // 128) * 128)
    embT = jnp.pad(emb.T, ((0, 0), (0, V_pad - V))).astype(bf)

    return {
        "emb": emb,                                   # f32, input embedding gather
        "class_embed": params["class_embed"],
        "start_token": params["start_token"],
        "pos_embed": params["pos_embed"],
        "a1w": params["a1w"], "a1b": params["a1b"],
        "a2w": params["a2w"], "a2b": params["a2b"],
        "qkvw": qkvw.astype(bf), "qkvb": qkvb,
        "ow": params["ow"].astype(bf), "ob": params["ob"],
        "upw": params["upw"].astype(bf), "upb": params["upb"],
        "dnw": params["dnw"].astype(bf), "dnb": params["dnb"],
        "ln_g": params["ln_g"], "ln_b": params["ln_b"],
        "embT": embT,
        "cosf": jnp.asarray(cosf), "sinf": jnp.asarray(sinf),
        "mask_bias": jnp.asarray(mask_bias),
    }


# ----------------------------------------------------------------------------
# fused transformer-blocks kernel: grid = (depth,), batch folded into the kernel
# ----------------------------------------------------------------------------
def _blocks_kernel(x_ref, ss_ref, bias_ref, cosf_ref, sinf_ref,
                   qkvw_ref, qkvb_ref, ow_ref, ob_ref,
                   upw_ref, upb_ref, dnw_ref, dnb_ref,
                   lng_ref, lnb_ref,
                   xn_ref, x_vmem):
    layer = pl.program_id(0)
    n_layers = pl.num_programs(0)
    BS, D = x_vmem.shape
    nh, S, hd = cosf_ref.shape
    B = BS // S
    d = 3 * (hd // 8)                 # mirrors the theta construction in make_theta
    bf = jnp.bfloat16

    @pl.when(layer == 0)
    def _():
        x_vmem[...] = x_ref[...]

    x = x_vmem[...]                   # (B*S, D) f32, resident across the depth axis
    ss = ss_ref[...]                  # (B, 4D) = [scale1 | shift1 | scale2 | shift2]

    def mod_ln(v, col0):
        mu = jnp.mean(v, axis=-1, keepdims=True)
        var = jnp.mean(jnp.square(v - mu), axis=-1, keepdims=True)
        vn = (v - mu) * jax.lax.rsqrt(var + 1e-5)
        rows = []
        for b in range(B):
            sc = ss[b:b + 1, col0:col0 + D]
            sh = ss[b:b + 1, col0 + D:col0 + 2 * D]
            rows.append(vn[b * S:(b + 1) * S] * (sc + 1.0) + sh)
        return jnp.concatenate(rows, axis=0) if B > 1 else rows[0]

    # --------------------------- self attention ---------------------------
    h = mod_ln(x, 0)
    qkv = jnp.dot(h.astype(bf), qkvw_ref[...],
                  preferred_element_type=jnp.float32) + qkvb_ref[...]      # (BS, 3D)

    # head split: static slices of the (BS, 3D) slab -> (B*nh, S, hd)
    # TODO(synk): at real dims (aligned head_dim) replace with pltpu.einshape.
    qs, ks, vs = [], [], []
    for b in range(B):
        r = b * S
        for hh in range(nh):
            c = hh * hd
            qs.append(qkv[r:r + S, c:c + hd])
            ks.append(qkv[r:r + S, D + c:D + c + hd])
            vs.append(qkv[r:r + S, 2 * D + c:2 * D + c + hd])
    q3 = jnp.stack(qs, axis=0)
    k3 = jnp.stack(ks, axis=0)
    v3 = jnp.stack(vs, axis=0)

    cosx = jnp.concatenate([cosf_ref[...]] * B, axis=0)      # (B*nh, S, hd)
    sinx = jnp.concatenate([sinf_ref[...]] * B, axis=0)

    def rope(t):
        # full-width elementwise rotation: one slice/concat builds the partner,
        # the sign is folded into the sin table.  TODO(synk): use pltpu.roll with
        # an interleaved head layout once head_dim is lane-aligned.
        parts = [t[..., d:2 * d], t[..., :d]]
        if 2 * d < hd:
            parts.append(t[..., 2 * d:])
        partner = jnp.concatenate(parts, axis=-1)
        return t * cosx + partner * sinx

    qr = rope(q3)                     # 1/sqrt(hd) is already folded into the q weights
    kr = rope(k3)

    s = jnp.einsum("zqd,zkd->zqk", qr.astype(bf), kr.astype(bf),
                   preferred_element_type=jnp.float32)
    s = s + bias_ref[...]             # additive block-causal mask, f32
    m = jnp.max(s, axis=-1, keepdims=True)
    e = jnp.exp(s - m)
    p = e * pl.reciprocal(jnp.sum(e, axis=-1, keepdims=True), approx=True)

    ctx = jnp.einsum("zqk,zkd->zqd", p.astype(bf), v3.astype(bf),
                     preferred_element_type=jnp.float32)                   # (B*nh,S,hd)
    attn = jnp.concatenate(
        [jnp.concatenate([ctx[b * nh + hh] for hh in range(nh)], axis=-1)
         for b in range(B)], axis=0)                                       # (BS, D)

    x = x + jnp.dot(attn.astype(bf), ow_ref[...],
                    preferred_element_type=jnp.float32) + ob_ref[...]

    # ----------------------------- feed forward -----------------------------
    h2 = mod_ln(x, 2 * D)
    u = jnp.dot(h2.astype(bf), upw_ref[...],
                preferred_element_type=jnp.float32) + upb_ref[...]
    # TODO(synk): PyTorch F.gelu defaults to exact erf; tanh approximation keeps the
    #             transcendental on the EUP slot and avoids an erf lowering dependency.
    c0 = 0.7978845608028654            # sqrt(2/pi)
    u = 0.5 * u * (1.0 + jnp.tanh(c0 * (u + 0.044715 * (u * u * u))))
    x = x + jnp.dot(u.astype(bf), dnw_ref[...],
                    preferred_element_type=jnp.float32) + dnb_ref[...]

    x_vmem[...] = x

    # final LayerNorm emitted once; the tied output head runs in a separate kernel
    @pl.when(layer == n_layers - 1)
    def _():
        mu = jnp.mean(x, axis=-1, keepdims=True)
        var = jnp.mean(jnp.square(x - mu), axis=-1, keepdims=True)
        xn = (x - mu) * jax.lax.rsqrt(var + 1e-5)
        xn = xn * lng_ref[...] + lnb_ref[...]
        xn_ref[...] = xn.astype(xn_ref.dtype)


# ----------------------------------------------------------------------------
# tied output head kernel: outside the depth loop, N-tiled over the padded vocab
# ----------------------------------------------------------------------------
def _head_kernel(xn_ref, embt_ref, o_ref):
    o_ref[...] = jnp.dot(xn_ref[...], embt_ref[...],
                         preferred_element_type=jnp.float32)


# ----------------------------------------------------------------------------
# pallas_call wrapper (+ plain-JAX glue)
# ----------------------------------------------------------------------------
def transformer_forward(tokens, prep):
    bf = jnp.bfloat16
    emb = prep["emb"]
    V, D = emb.shape
    depth = prep["qkvw"].shape[0]
    H = prep["upw"].shape[2]
    nh, S, hd = prep["cosf"].shape
    V_pad = prep["embT"].shape[1]
    B = tokens.shape[0]
    BS = B * S

    # embedding gathers / concat / pos embed: plain-JAX glue (XLA)
    x = emb[tokens[:, 1:]]                                     # (B, S-1, D)
    cond = prep["class_embed"][tokens[:, 0]]                   # (B, 256)
    start = jnp.broadcast_to(prep["start_token"][None, None, :], (B, 1, D))
    x = jnp.concatenate([start, x], axis=1) + prep["pos_embed"][:S]
    x = x.reshape(BS, D).astype(jnp.float32)                   # dropout p=0.0 -> identity

    # AdaLN conditioning for all layers in one batched matmul (hoisted from kernel)
    ss1 = jnp.einsum("bc,lcf->lbf", cond, prep["a1w"]) + prep["a1b"]
    ss2 = jnp.einsum("bc,lcf->lbf", cond, prep["a2w"]) + prep["a2b"]
    ss = jnp.concatenate([ss1, ss2], axis=-1).astype(jnp.float32)  # (depth, B, 4D)

    in_specs = [
        pl.BlockSpec((BS, D), lambda l: (0, 0)),               # x0 (fetched once)
        pl.BlockSpec((None, B, 4 * D), lambda l: (l, 0, 0)),   # AdaLN scale/shift
        pl.BlockSpec((S, S), lambda l: (0, 0)),                # mask bias
        pl.BlockSpec((nh, S, hd), lambda l: (0, 0, 0)),        # cos table
        pl.BlockSpec((nh, S, hd), lambda l: (0, 0, 0)),        # sin table (sign folded)
        pl.BlockSpec((None, D, 3 * D), lambda l: (l, 0, 0)),   # qkvw (bf16)
        pl.BlockSpec((None, 1, 3 * D), lambda l: (l, 0, 0)),   # qkvb
        pl.BlockSpec((None, D, D), lambda l: (l, 0, 0)),       # ow
        pl.BlockSpec((None, 1, D), lambda l: (l, 0, 0)),       # ob
        pl.BlockSpec((None, D, H), lambda l: (l, 0, 0)),       # upw
        pl.BlockSpec((None, 1, H), lambda l: (l, 0, 0)),       # upb
        pl.BlockSpec((None, H, D), lambda l: (l, 0, 0)),       # dnw
        pl.BlockSpec((None, 1, D), lambda l: (l, 0, 0)),       # dnb
        pl.BlockSpec((1, D), lambda l: (0, 0)),                # out-norm gamma
        pl.BlockSpec((1, D), lambda l: (0, 0)),                # out-norm beta
    ]

    xn = pl.pallas_call(
        _blocks_kernel,
        grid=(depth,),
        in_specs=in_specs,
        out_specs=pl.BlockSpec((BS, D), lambda l: (0, 0)),
        out_shape=jax.ShapeDtypeStruct((BS, D), bf),
        scratch_shapes=[pltpu.VMEM((BS, D), jnp.float32)],
        compiler_params=pltpu.CompilerParams(
            dimension_semantics=("arbitrary",),
            vmem_limit_bytes=64 * 1024 * 1024),
    )(x, ss, prep["mask_bias"], prep["cosf"], prep["sinf"],
      prep["qkvw"], prep["qkvb"], prep["ow"], prep["ob"],
      prep["upw"], prep["upb"], prep["dnw"], prep["dnb"],
      prep["ln_g"], prep["ln_b"])

    # tied output head, lane-dense and tiled over the padded vocab
    v_tile = 1024 if V_pad % 1024 == 0 else 128
    logits = pl.pallas_call(
        _head_kernel,
        grid=(V_pad // v_tile,),
        in_specs=[pl.BlockSpec((BS, D), lambda j: (0, 0)),
                  pl.BlockSpec((D, v_tile), lambda j: (0, j))],
        out_specs=pl.BlockSpec((BS, v_tile), lambda j: (0, j)),
        out_shape=jax.ShapeDtypeStruct((BS, V_pad), jnp.float32),
        compiler_params=pltpu.CompilerParams(
            dimension_semantics=("parallel",),
            vmem_limit_bytes=64 * 1024 * 1024),
    )(xn, prep["embT"])

    return logits.reshape(B, S, V_pad)[:, :, :V]


# ----------------------------------------------------------------------------
# pure-JAX reference (PyTorch math, same bf16 matmul precision) for verification
# ----------------------------------------------------------------------------
def ref_forward(tokens, params, sizes, head_dim):
    bf = jnp.bfloat16
    emb = params["emb"]
    V, D = emb.shape
    hd = head_dim
    nh = D // hd
    depth = params["qkvw"].shape[0]
    B, S = tokens.shape

    theta = jnp.asarray(make_theta(sizes, hd, nh)[:S].transpose(1, 0, 2))  # (nh,S,d)
    d = theta.shape[-1]
    cos, sin = jnp.cos(theta), jnp.sin(theta)
    mask = make_block_causal_mask(tuple(sz * sz for sz in sizes))[:S, :S]
    mask_bias = jnp.asarray(np.where(mask > 0.5, 0.0, -1e30), np.float32)

    x = emb[tokens[:, 1:]]
    cond = params["class_embed"][tokens[:, 0]]
    start = jnp.broadcast_to(params["start_token"][None, None, :], (B, 1, D))
    x = jnp.concatenate([start, x], axis=1) + params["pos_embed"][:S]

    def mm(a, w):
        return jnp.dot(a.astype(bf), w.astype(bf), preferred_element_type=jnp.float32)

    def mod_ln(v, scale, shift):
        mu = v.mean(-1, keepdims=True)
        var = jnp.mean(jnp.square(v - mu), -1, keepdims=True)
        return (v - mu) * jax.lax.rsqrt(var + 1e-5) * (scale + 1.0) + shift

    def rope(t):                                  # t: (B, nh, S, hd)
        t1, t2, t3 = t[..., :d], t[..., d:2 * d], t[..., 2 * d:]
        return jnp.concatenate([t1 * cos - t2 * sin, t2 * cos + t1 * sin, t3], axis=-1)

    for l in range(depth):
        sb = cond @ params["a1w"][l] + params["a1b"][l]
        h = mod_ln(x, sb[:, None, :D], sb[:, None, D:])
        qkv = mm(h.reshape(B * S, D), params["qkvw"][l]) + params["qkvb"][l]
        qkv = qkv.reshape(B, S, 3, nh, hd).transpose(2, 0, 3, 1, 4)
        q, k, v = qkv[0], qkv[1], qkv[2]          # (B, nh, S, hd)
        qr = rope(q) * hd ** -0.5
        kr = rope(k)
        s = jnp.einsum("bhqd,bhkd->bhqk", qr.astype(bf), kr.astype(bf),
                       preferred_element_type=jnp.float32) + mask_bias
        p = jax.nn.softmax(s, axis=-1)
        o = jnp.einsum("bhqk,bhkd->bhqd", p.astype(bf), v.astype(bf),
                       preferred_element_type=jnp.float32)
        attn = o.transpose(0, 2, 1, 3).reshape(B, S, D)
        x = x + (mm(attn.reshape(B * S, D), params["ow"][l])
                 + params["ob"][l]).reshape(B, S, D)

        sb2 = cond @ params["a2w"][l] + params["a2b"][l]
        h2 = mod_ln(x, sb2[:, None, :D], sb2[:, None, D:])
        u = jax.nn.gelu(mm(h2.reshape(B * S, D), params["upw"][l]) + params["upb"][l],
                        approximate=True)
        x = x + (mm(u, params["dnw"][l]) + params["dnb"][l]).reshape(B, S, D)

    mu = x.mean(-1, keepdims=True)
    var = jnp.mean(jnp.square(x - mu), -1, keepdims=True)
    xn = (x - mu) * jax.lax.rsqrt(var + 1e-5) * params["ln_g"] + params["ln_b"]
    return mm(xn.reshape(B * S, D), emb.T).reshape(B, S, V)


# ----------------------------------------------------------------------------
# deterministic parameter init (shapes follow the PyTorch __init__, stacked by layer)
# ----------------------------------------------------------------------------
def init_params(key, depth, dim, hidden_dim, head_dim, vocab, total):
    ks = jax.random.split(key, 16)
    s = 0.02
    # NOTE: PyTorch zero-inits the AdaLN projections; small random values here
    # exercise the conditioning path (forward semantics unchanged).
    return {
        "class_embed": jax.random.normal(ks[0], (10, 256), jnp.float32),
        "start_token": jax.random.normal(ks[1], (dim,), jnp.float32),
        "emb": jax.random.normal(ks[2], (vocab, dim), jnp.float32),
        "pos_embed": jax.random.normal(ks[3], (total, dim), jnp.float32) * dim ** -0.5,
        "ln_g": jnp.ones((1, dim), jnp.float32),
        "ln_b": jnp.zeros((1, dim), jnp.float32),
        "a1w": jax.random.normal(ks[4], (depth, 256, 2 * dim), jnp.float32) * s,
        "a1b": jax.random.normal(ks[5], (depth, 1, 2 * dim), jnp.float32) * s,
        "a2w": jax.random.normal(ks[6], (depth, 256, 2 * dim), jnp.float32) * s,
        "a2b": jax.random.normal(ks[7], (depth, 1, 2 * dim), jnp.float32) * s,
        "qkvw": jax.random.normal(ks[8], (depth, dim, 3 * dim), jnp.float32) * dim ** -0.5,
        "qkvb": jax.random.normal(ks[9], (depth, 1, 3 * dim), jnp.float32) * s,
        "ow": jax.random.normal(ks[10], (depth, dim, dim), jnp.float32) * dim ** -0.5,
        "ob": jax.random.normal(ks[11], (depth, 1, dim), jnp.float32) * s,
        "upw": jax.random.normal(ks[12], (depth, dim, hidden_dim), jnp.float32) * dim ** -0.5,
        "upb": jax.random.normal(ks[13], (depth, 1, hidden_dim), jnp.float32) * s,
        "dnw": jax.random.normal(ks[14], (depth, hidden_dim, dim), jnp.float32) * hidden_dim ** -0.5,
        "dnb": jax.random.normal(ks[15], (depth, 1, dim), jnp.float32) * s,
    }


if __name__ == "__main__":
    depth, dim, hidden_dim, head_dim, vocab = 2, 32, 64, 16, 32
    sizes = (1, 2, 4)
    total = sum(sz * sz for sz in sizes)       # 21 = sequence length
    B = 2

    key = jax.random.PRNGKey(0)
    kp, kt = jax.random.split(key)
    params = init_params(kp, depth, dim, hidden_dim, head_dim, vocab, total)
    prep = prepare_inputs(params, sizes, head_dim)   # one-time weight prep (outside jit)

    k1, k2 = jax.random.split(kt)
    cls = jax.random.randint(k1, (B, 1), 0, 10)
    toks = jax.random.randint(k2, (B, total - 1), 0, vocab)
    tokens = jnp.concatenate([cls, toks], axis=1).astype(jnp.int32)   # (B, total)

    fwd = jax.jit(transformer_forward)
    out = jax.block_until_ready(fwd(tokens, prep))
    assert out.shape == (B, total, vocab)

    ref = jax.block_until_ready(ref_forward(tokens, params, sizes, head_dim))

    out_np = np.asarray(out)
    ref_np = np.asarray(ref)
    # bf16 MXU matmuls + approx EUP reciprocal -> compare at 2% of the logit scale.
    scale = max(1.0, float(np.abs(ref_np).max()))
    np.testing.assert_allclose(out_np, ref_np, rtol=2e-2, atol=2e-2 * scale)

    print("KERNEL_OK")
</pallas_src>

<mosaic_0001>
module attributes {stable_mosaic.version = 11 : i64} {
  func.func @_head_kernel(%arg0: i32, %arg1: memref<42x32xbf16, #tpu.memory_space<vmem>>, %arg2: memref<32x128xbf16, #tpu.memory_space<vmem>>, %arg3: memref<42x128xf32, #tpu.memory_space<vmem>>) attributes {dimension_semantics = [#tpu.dimension_semantics<parallel>], iteration_bounds = array<i64: 1>, scalar_prefetch = 0 : i64, scratch_operands = 0 : i64, tpu.core_type = #tpu.core_type<tc>, window_params = [{pipeline_mode = #tpu.pipeline_mode<synchronous>, transform_indices = @transform_0, window_bounds = array<i64: 42, 32>}, {transform_indices = @transform_1, window_bounds = array<i64: 32, 128>}, {transform_indices = @transform_2, window_bounds = array<i64: 42, 128>}]} {
    %c0 = arith.constant 0 : index
    %c0_0 = arith.constant 0 : index
    %0 = vector.load %arg1[%c0, %c0_0] : memref<42x32xbf16, #tpu.memory_space<vmem>>, vector<42x32xbf16>
    %c0_1 = arith.constant 0 : index
    %c0_2 = arith.constant 0 : index
    %1 = vector.load %arg2[%c0_1, %c0_2] : memref<32x128xbf16, #tpu.memory_space<vmem>>, vector<32x128xbf16>
    %cst = arith.constant dense<0.000000e+00> : vector<42x128xf32>
    %2 = tpu.matmul %0, %1, %cst {dimension_numbers = #tpu.dot_dimension_numbers<[1], [0], [0], [1], [0, 0, 1, 1], [], []>} : vector<42x32xbf16>, vector<32x128xbf16>, vector<42x128xf32> -> vector<42x128xf32>
    %c0_3 = arith.constant 0 : index
    %c0_4 = arith.constant 0 : index
    %3 = vector.load %arg3[%c0_3, %c0_4] : memref<42x128xf32, #tpu.memory_space<vmem>>, vector<42x128xf32>
    tpu.vector_store %arg3[%c0_3, %c0_4], %2 {strides = array<i32>} : memref<42x128xf32, #tpu.memory_space<vmem>>, vector<42x128xf32>,
    return
  }
  func.func @transform_0(%arg0: i32) -> (i32, i32) {
    %c0_i32 = arith.constant 0 : i32
    %c0_i32_0 = arith.constant 0 : i32
    %c0_i32_1 = arith.constant 0 : i32
    return %c0_i32, %c0_i32_0 : i32, i32
  }
  func.func @transform_1(%arg0: i32) -> (i32, i32) {
    %c0_i32 = arith.constant 0 : i32
    %c0_i32_0 = arith.constant 0 : i32
    return %c0_i32, %arg0 : i32, i32
  }
  func.func @transform_2(%arg0: i32) -> (i32, i32) {
    %c0_i32 = arith.constant 0 : i32
    %c0_i32_0 = arith.constant 0 : i32
    return %c0_i32, %arg0 : i32, i32
  }
}

module attributes {stable_mosaic.version = 11 : i64} {
  func.func @_blocks_kernel(%arg0: i32, %arg1: memref<42x32xf32, #tpu.memory_space<vmem>>, %arg2: memref<1x2x128xf32, #tpu.memory_space<vmem>>, %arg3: memref<21x21xf32, #tpu.memory_space<vmem>>, %arg4: memref<2x21x16xf32, #tpu.memory_space<vmem>>, %arg5: memref<2x21x16xf32, #tpu.memory_space<vmem>>, %arg6: memref<1x32x96xbf16, #tpu.memory_space<vmem>>, %arg7: memref<1x1x96xf32, #tpu.memory_space<vmem>>, %arg8: memref<1x32x32xbf16, #tpu.memory_space<vmem>>, %arg9: memref<1x1x32xf32, #tpu.memory_space<vmem>>, %arg10: memref<1x32x64xbf16, #tpu.memory_space<vmem>>, %arg11: memref<1x1x64xf32, #tpu.memory_space<vmem>>, %arg12: memref<1x64x32xbf16, #tpu.memory_space<vmem>>, %arg13: memref<1x1x32xf32, #tpu.memory_space<vmem>>, %arg14: memref<1x32xf32, #tpu.memory_space<vmem>>, %arg15: memref<1x32xf32, #tpu.memory_space<vmem>>, %arg16: memref<42x32xbf16, #tpu.memory_space<vmem>>, %arg17: memref<42x32xf32, #tpu.memory_space<vmem>>) attributes {dimension_semantics = [#tpu.dimension_semantics<arbitrary>], iteration_bounds = array<i64: 2>, scalar_prefetch = 0 : i64, scratch_operands = 1 : i64, tpu.core_type = #tpu.core_type<tc>, window_params = [{pipeline_mode = #tpu.pipeline_mode<synchronous>, transform_indices = @transform_0, window_bounds = array<i64: 42, 32>}, {transform_indices = @transform_1, window_bounds = array<i64: 1, 2, 128>}, {pipeline_mode = #tpu.pipeline_mode<synchronous>, transform_indices = @transform_2, window_bounds = array<i64: 21, 21>}, {pipeline_mode = #tpu.pipeline_mode<synchronous>, transform_indices = @transform_3, window_bounds = array<i64: 2, 21, 16>}, {pipeline_mode = #tpu.pipeline_mode<synchronous>, transform_indices = @transform_4, window_bounds = array<i64: 2, 21, 16>}, {transform_indices = @transform_5, window_bounds = array<i64: 1, 32, 96>}, {transform_indices = @transform_6, window_bounds = array<i64: 1, 1, 96>}, {transform_indices = @transform_7, window_bounds = array<i64: 1, 32, 32>}, {transform_indices = @transform_8, window_bounds = array<i64: 1, 1, 32>}, {transform_indices = @transform_9, window_bounds = array<i64: 1, 32, 64>}, {transform_indices = @transform_10, window_bounds = array<i64: 1, 1, 64>}, {transform_indices = @transform_11, window_bounds = array<i64: 1, 64, 32>}, {transform_indices = @transform_12, window_bounds = array<i64: 1, 1, 32>}, {pipeline_mode = #tpu.pipeline_mode<synchronous>, transform_indices = @transform_13, window_bounds = array<i64: 1, 32>}, {pipeline_mode = #tpu.pipeline_mode<synchronous>, transform_indices = @transform_14, window_bounds = array<i64: 1, 32>}, {pipeline_mode = #tpu.pipeline_mode<synchronous>, transform_indices = @transform_15, window_bounds = array<i64: 42, 32>}]} {
    %c0_i32 = arith.constant 0 : i32
    %0 = arith.cmpi eq, %arg0, %c0_i32 : i32
    %1 = arith.extui %0 : i1 to i32
    %c0_i32_0 = arith.constant 0 : i32
    %2 = arith.cmpi ne, %1, %c0_i32_0 : i32
    scf.if %2 {
      %c0_65 = arith.constant 0 : index
      %c0_66 = arith.constant 0 : index
      %207 = vector.load %arg1[%c0_65, %c0_66] : memref<42x32xf32, #tpu.memory_space<vmem>>, vector<42x32xf32>
      %c0_67 = arith.constant 0 : index
      %c0_68 = arith.constant 0 : index
      %208 = vector.load %arg17[%c0_67, %c0_68] : memref<42x32xf32, #tpu.memory_space<vmem>>, vector<42x32xf32>
      tpu.vector_store %arg17[%c0_67, %c0_68], %207 {strides = array<i32>} : memref<42x32xf32, #tpu.memory_space<vmem>>, vector<42x32xf32>,
    } else {
    }
    %c0 = arith.constant 0 : index
    %c0_1 = arith.constant 0 : index
    %3 = vector.load %arg17[%c0, %c0_1] : memref<42x32xf32, #tpu.memory_space<vmem>>, vector<42x32xf32>
    %c0_2 = arith.constant 0 : index
    %c0_3 = arith.constant 0 : index
    %c0_4 = arith.constant 0 : index
    %4 = vector.load %arg2[%c0_2, %c0_3, %c0_4] : memref<1x2x128xf32, #tpu.memory_space<vmem>>, vector<1x2x128xf32>
    %5 = vector.shape_cast %4 : vector<1x2x128xf32> to vector<2x128xf32>
    %cst = arith.constant dense<0.000000e+00> : vector<42xf32>
    %6 = vector.multi_reduction <add>, %3, %cst [1] : vector<42x32xf32> to vector<42xf32>
    %7 = vector.shape_cast %6 : vector<42xf32> to vector<42x1xf32>
    %cst_5 = arith.constant 3.200000e+01 : f32
    %8 = vector.broadcast %cst_5 : f32 to vector<42x1xf32>
    %9 = arith.divf %7, %8 : vector<42x1xf32>
    %10 = vector.broadcast %9 : vector<42x1xf32> to vector<42x32xf32>
    %11 = arith.subf %3, %10 : vector<42x32xf32>
    %12 = arith.mulf %11, %11 : vector<42x32xf32>
    %cst_6 = arith.constant dense<0.000000e+00> : vector<42xf32>
    %13 = vector.multi_reduction <add>, %12, %cst_6 [1] : vector<42x32xf32> to vector<42xf32>
    %14 = vector.shape_cast %13 : vector<42xf32> to vector<42x1xf32>
    %cst_7 = arith.constant 3.200000e+01 : f32
    %15 = vector.broadcast %cst_7 : f32 to vector<42x1xf32>
    %16 = arith.divf %14, %15 : vector<42x1xf32>
    %17 = vector.broadcast %9 : vector<42x1xf32> to vector<42x32xf32>
    %18 = arith.subf %3, %17 : vector<42x32xf32>
    %cst_8 = arith.constant 9.99999974E-6 : f32
    %19 = vector.broadcast %cst_8 : f32 to vector<42x1xf32>
    %20 = arith.addf %16, %19 : vector<42x1xf32>
    %21 = math.rsqrt %20 : vector<42x1xf32>
    %22 = vector.broadcast %21 : vector<42x1xf32> to vector<42x32xf32>
    %23 = arith.mulf %18, %22 : vector<42x32xf32>
    %24 = vector.extract_strided_slice %5 {offsets = [0, 0], sizes = [1, 32], strides = [1, 1]} : vector<2x128xf32> to vector<1x32xf32>
    %25 = vector.extract_strided_slice %5 {offsets = [0, 32], sizes = [1, 32], strides = [1, 1]} : vector<2x128xf32> to vector<1x32xf32>
    %26 = vector.extract_strided_slice %23 {offsets = [0, 0], sizes = [21, 32], strides = [1, 1]} : vector<42x32xf32> to vector<21x32xf32>
    %cst_9 = arith.constant 1.000000e+00 : f32
    %27 = vector.broadcast %cst_9 : f32 to vector<1x32xf32>
    %28 = arith.addf %24, %27 : vector<1x32xf32>
    %29 = vector.broadcast %28 : vector<1x32xf32> to vector<21x32xf32>
    %30 = arith.mulf %26, %29 : vector<21x32xf32>
    %31 = vector.broadcast %25 : vector<1x32xf32> to vector<21x32xf32>
    %32 = arith.addf %30, %31 : vector<21x32xf32>
    %33 = vector.extract_strided_slice %5 {offsets = [1, 0], sizes = [1, 32], strides = [1, 1]} : vector<2x128xf32> to vector<1x32xf32>
    %34 = vector.extract_strided_slice %5 {offsets = [1, 32], sizes = [1, 32], strides = [1, 1]} : vector<2x128xf32> to vector<1x32xf32>
    %35 = vector.extract_strided_slice %23 {offsets = [21, 0], sizes = [21, 32], strides = [1, 1]} : vector<42x32xf32> to vector<21x32xf32>
    %cst_10 = arith.constant 1.000000e+00 : f32
    %36 = vector.broadcast %cst_10 : f32 to vector<1x32xf32>
    %37 = arith.addf %33, %36 : vector<1x32xf32>
    %38 = vector.broadcast %37 : vector<1x32xf32> to vector<21x32xf32>
    %39 = arith.mulf %35, %38 : vector<21x32xf32>
    %40 = vector.broadcast %34 : vector<1x32xf32> to vector<21x32xf32>
    %41 = arith.addf %39, %40 : vector<21x32xf32>
    %42 = tpu.concatenate %32, %41 in 0 : vector<21x32xf32>, vector<21x32xf32> -> vector<42x32xf32>
    %43 = arith.truncf %42 : vector<42x32xf32> to vector<42x32xbf16>
    %c0_11 = arith.constant 0 : index
    %c0_12 = arith.constant 0 : index
    %c0_13 = arith.constant 0 : index
    %44 = vector.load %arg6[%c0_11, %c0_12, %c0_13] : memref<1x32x96xbf16, #tpu.memory_space<vmem>>, vector<1x32x96xbf16>
    %45 = vector.shape_cast %44 : vector<1x32x96xbf16> to vector<32x96xbf16>
    %cst_14 = arith.constant dense<0.000000e+00> : vector<42x96xf32>
    %46 = tpu.matmul %43, %45, %cst_14 {dimension_numbers = #tpu.dot_dimension_numbers<[1], [0], [0], [1], [0, 0, 1, 1], [], []>} : vector<42x32xbf16>, vector<32x96xbf16>, vector<42x96xf32> -> vector<42x96xf32>
    %c0_15 = arith.constant 0 : index
    %c0_16 = arith.constant 0 : index
    %c0_17 = arith.constant 0 : index
    %47 = vector.load %arg7[%c0_15, %c0_16, %c0_17] : memref<1x1x96xf32, #tpu.memory_space<vmem>>, vector<1x1x96xf32>
    %48 = vector.shape_cast %47 : vector<1x1x96xf32> to vector<1x96xf32>
    %49 = vector.broadcast %48 : vector<1x96xf32> to vector<42x96xf32>
    %50 = arith.addf %46, %49 : vector<42x96xf32>
    %51 = vector.extract_strided_slice %50 {offsets = [0, 0], sizes = [21, 16], strides = [1, 1]} : vector<42x96xf32> to vector<21x16xf32>
    %52 = vector.extract_strided_slice %50 {offsets = [0, 32], sizes = [21, 16], strides = [1, 1]} : vector<42x96xf32> to vector<21x16xf32>
    %53 = vector.extract_strided_slice %50 {offsets = [0, 64], sizes = [21, 16], strides = [1, 1]} : vector<42x96xf32> to vector<21x16xf32>
    %54 = vector.extract_strided_slice %50 {offsets = [0, 16], sizes = [21, 16], strides = [1, 1]} : vector<42x96xf32> to vector<21x16xf32>
    %55 = vector.extract_strided_slice %50 {offsets = [0, 48], sizes = [21, 16], strides = [1, 1]} : vector<42x96xf32> to vector<21x16xf32>
    %56 = vector.extract_strided_slice %50 {offsets = [0, 80], sizes = [21, 16], strides = [1, 1]} : vector<42x96xf32> to vector<21x16xf32>
    %57 = vector.extract_strided_slice %50 {offsets = [21, 0], sizes = [21, 16], strides = [1, 1]} : vector<42x96xf32> to vector<21x16xf32>
    %58 = vector.extract_strided_slice %50 {offsets = [21, 32], sizes = [21, 16], strides = [1, 1]} : vector<42x96xf32> to vector<21x16xf32>
    %59 = vector.extract_strided_slice %50 {offsets = [21, 64], sizes = [21, 16], strides = [1, 1]} : vector<42x96xf32> to vector<21x16xf32>
    %60 = vector.extract_strided_slice %50 {offsets = [21, 16], sizes = [21, 16], strides = [1, 1]} : vector<42x96xf32> to vector<21x16xf32>
    %61 = vector.extract_strided_slice %50 {offsets = [21, 48], sizes = [21, 16], strides = [1, 1]} : vector<42x96xf32> to vector<21x16xf32>
    %62 = vector.extract_strided_slice %50 {offsets = [21, 80], sizes = [21, 16], strides = [1, 1]} : vector<42x96xf32> to vector<21x16xf32>
    %63 = vector.shape_cast %51 : vector<21x16xf32> to vector<1x21x16xf32>
    %64 = vector.shape_cast %54 : vector<21x16xf32> to vector<1x21x16xf32>
    %65 = vector.shape_cast %57 : vector<21x16xf32> to vector<1x21x16xf32>
    %66 = vector.shape_cast %60 : vector<21x16xf32> to vector<1x21x16xf32>
    %67 = tpu.concatenate %63, %64, %65, %66 in 0 : vector<1x21x16xf32>, vector<1x21x16xf32>, vector<1x21x16xf32>, vector<1x21x16xf32> -> vector<4x21x16xf32>
    %68 = vector.shape_cast %52 : vector<21x16xf32> to vector<1x21x16xf32>
    %69 = vector.shape_cast %55 : vector<21x16xf32> to vector<1x21x16xf32>
    %70 = vector.shape_cast %58 : vector<21x16xf32> to vector<1x21x16xf32>
    %71 = vector.shape_cast %61 : vector<21x16xf32> to vector<1x21x16xf32>
    %72 = tpu.concatenate %68, %69, %70, %71 in 0 : vector<1x21x16xf32>, vector<1x21x16xf32>, vector<1x21x16xf32>, vector<1x21x16xf32> -> vector<4x21x16xf32>
    %73 = vector.shape_cast %53 : vector<21x16xf32> to vector<1x21x16xf32>
    %74 = vector.shape_cast %56 : vector<21x16xf32> to vector<1x21x16xf32>
    %75 = vector.shape_cast %59 : vector<21x16xf32> to vector<1x21x16xf32>
    %76 = vector.shape_cast %62 : vector<21x16xf32> to vector<1x21x16xf32>
    %77 = tpu.concatenate %73, %74, %75, %76 in 0 : vector<1x21x16xf32>, vector<1x21x16xf32>, vector<1x21x16xf32>, vector<1x21x16xf32> -> vector<4x21x16xf32>
    %c0_18 = arith.constant 0 : index
    %c0_19 = arith.constant 0 : index
    %c0_20 = arith.constant 0 : index
    %78 = vector.load %arg4[%c0_18, %c0_19, %c0_20] : memref<2x21x16xf32, #tpu.memory_space<vmem>>, vector<2x21x16xf32>
    %79 = tpu.concatenate %78, %78 in 0 : vector<2x21x16xf32>, vector<2x21x16xf32> -> vector<4x21x16xf32>
    %c0_21 = arith.constant 0 : index
    %c0_22 = arith.constant 0 : index
    %c0_23 = arith.constant 0 : index
    %80 = vector.load %arg5[%c0_21, %c0_22, %c0_23] : memref<2x21x16xf32, #tpu.memory_space<vmem>>, vector<2x21x16xf32>
    %81 = tpu.concatenate %80, %80 in 0 : vector<2x21x16xf32>, vector<2x21x16xf32> -> vector<4x21x16xf32>
    %82 = vector.extract_strided_slice %67 {offsets = [0, 0, 6], sizes = [4, 21, 6], strides = [1, 1, 1]} : vector<4x21x16xf32> to vector<4x21x6xf32>
    %83 = vector.extract_strided_slice %67 {offsets = [0, 0, 0], sizes = [4, 21, 6], strides = [1, 1, 1]} : vector<4x21x16xf32> to vector<4x21x6xf32>
    %84 = vector.extract_strided_slice %67 {offsets = [0, 0, 12], sizes = [4, 21, 4], strides = [1, 1, 1]} : vector<4x21x16xf32> to vector<4x21x4xf32>
    %85 = tpu.concatenate %82, %83, %84 in 2 : vector<4x21x6xf32>, vector<4x21x6xf32>, vector<4x21x4xf32> -> vector<4x21x16xf32>
    %86 = arith.mulf %67, %79 : vector<4x21x16xf32>
    %87 = arith.mulf %85, %81 : vector<4x21x16xf32>
    %88 = arith.addf %86, %87 : vector<4x21x16xf32>
    %89 = vector.extract_strided_slice %72 {offsets = [0, 0, 6], sizes = [4, 21, 6], strides = [1, 1, 1]} : vector<4x21x16xf32> to vector<4x21x6xf32>
    %90 = vector.extract_strided_slice %72 {offsets = [0, 0, 0], sizes = [4, 21, 6], strides = [1, 1, 1]} : vector<4x21x16xf32> to vector<4x21x6xf32>
    %91 = vector.extract_strided_slice %72 {offsets = [0, 0, 12], sizes = [4, 21, 4], strides = [1, 1, 1]} : vector<4x21x16xf32> to vector<4x21x4xf32>
    %92 = tpu.concatenate %89, %90, %91 in 2 : vector<4x21x6xf32>, vector<4x21x6xf32>, vector<4x21x4xf32> -> vector<4x21x16xf32>
    %93 = arith.mulf %72, %79 : vector<4x21x16xf32>
    %94 = arith.mulf %92, %81 : vector<4x21x16xf32>
    %95 = arith.addf %93, %94 : vector<4x21x16xf32>
    %96 = arith.truncf %88 : vector<4x21x16xf32> to vector<4x21x16xbf16>
    %97 = arith.truncf %95 : vector<4x21x16xf32> to vector<4x21x16xbf16>
    "tpu.trace_start"() <{level = 10 : i32, message = "zqd,zkd->zqk"}> : () -> ()
    %cst_24 = arith.constant dense<0.000000e+00> : vector<4x21x21xf32>
    %98 = tpu.matmul %96, %97, %cst_24 {dimension_numbers = #tpu.dot_dimension_numbers<[2], [2], [1], [1], [0, 0, 0, 1, 1, 1], [0], [0]>} : vector<4x21x16xbf16>, vector<4x21x16xbf16>, vector<4x21x21xf32> -> vector<4x21x21xf32>
    "tpu.trace_stop"() : () -> ()
    %c0_25 = arith.constant 0 : index
    %c0_26 = arith.constant 0 : index
    %99 = vector.load %arg3[%c0_25, %c0_26] : memref<21x21xf32, #tpu.memory_space<vmem>>, vector<21x21xf32>
    %100 = vector.shape_cast %99 : vector<21x21xf32> to vector<1x21x21xf32>
    %101 = vector.broadcast %100 : vector<1x21x21xf32> to vector<4x21x21xf32>
    %102 = arith.addf %98, %101 : vector<4x21x21xf32>
    %cst_27 = arith.constant dense<0xFF800000> : vector<4x21xf32>
    %103 = vector.multi_reduction <maximumf>, %102, %cst_27 [2] : vector<4x21x21xf32> to vector<4x21xf32>
    %104 = vector.shape_cast %103 : vector<4x21xf32> to vector<4x21x1xf32>
    %105 = vector.broadcast %104 : vector<4x21x1xf32> to vector<4x21x21xf32>
    %106 = arith.subf %102, %105 : vector<4x21x21xf32>
    %107 = math.exp %106 : vector<4x21x21xf32>
    %cst_28 = arith.constant dense<0.000000e+00> : vector<4x21xf32>
    %108 = vector.multi_reduction <add>, %107, %cst_28 [2] : vector<4x21x21xf32> to vector<4x21xf32>
    %109 = vector.shape_cast %108 : vector<4x21xf32> to vector<4x21x1xf32>
    %110 = tpu.reciprocal %109 {approx = true} : vector<4x21x1xf32> -> vector<4x21x1xf32>
    %111 = vector.broadcast %110 : vector<4x21x1xf32> to vector<4x21x21xf32>
    %112 = arith.mulf %107, %111 : vector<4x21x21xf32>
    %113 = arith.truncf %112 : vector<4x21x21xf32> to vector<4x21x21xbf16>
    %114 = arith.truncf %77 : vector<4x21x16xf32> to vector<4x21x16xbf16>
    "tpu.trace_start"() <{level = 10 : i32, message = "zqk,zkd->zqd"}> : () -> ()
    %cst_29 = arith.constant dense<0.000000e+00> : vector<4x21x16xf32>
    %115 = tpu.matmul %113, %114, %cst_29 {dimension_numbers = #tpu.dot_dimension_numbers<[2], [1], [1], [2], [0, 0, 0, 1, 1, 2], [0], [0]>} : vector<4x21x21xbf16>, vector<4x21x16xbf16>, vector<4x21x16xf32> -> vector<4x21x16xf32>
    "tpu.trace_stop"() : () -> ()
    %116 = vector.extract_strided_slice %115 {offsets = [0, 0, 0], sizes = [1, 21, 16], strides = [1, 1, 1]} : vector<4x21x16xf32> to vector<1x21x16xf32>
    %117 = vector.shape_cast %116 : vector<1x21x16xf32> to vector<21x16xf32>
    %118 = vector.extract_strided_slice %115 {offsets = [1, 0, 0], sizes = [1, 21, 16], strides = [1, 1, 1]} : vector<4x21x16xf32> to vector<1x21x16xf32>
    %119 = vector.shape_cast %118 : vector<1x21x16xf32> to vector<21x16xf32>
    %120 = tpu.concatenate %117, %119 in 1 : vector<21x16xf32>, vector<21x16xf32> -> vector<21x32xf32>
    %121 = vector.extract_strided_slice %115 {offsets = [2, 0, 0], sizes = [1, 21, 16], strides = [1, 1, 1]} : vector<4x21x16xf32> to vector<1x21x16xf32>
    %122 = vector.shape_cast %121 : vector<1x21x16xf32> to vector<21x16xf32>
    %123 = vector.extract_strided_slice %115 {offsets = [3, 0, 0], sizes = [1, 21, 16], strides = [1, 1, 1]} : vector<4x21x16xf32> to vector<1x21x16xf32>
    %124 = vector.shape_cast %123 : vector<1x21x16xf32> to vector<21x16xf32>
    %125 = tpu.concatenate %122, %124 in 1 : vector<21x16xf32>, vector<21x16xf32> -> vector<21x32xf32>
    %126 = tpu.concatenate %120, %125 in 0 : vector<21x32xf32>, vector<21x32xf32> -> vector<42x32xf32>
    %127 = arith.truncf %126 : vector<42x32xf32> to vector<42x32xbf16>
    %c0_30 = arith.constant 0 : index
    %c0_31 = arith.constant 0 : index
    %c0_32 = arith.constant 0 : index
    %128 = vector.load %arg8[%c0_30, %c0_31, %c0_32] : memref<1x32x32xbf16, #tpu.memory_space<vmem>>, vector<1x32x32xbf16>
    %129 = vector.shape_cast %128 : vector<1x32x32xbf16> to vector<32x32xbf16>
    %cst_33 = arith.constant dense<0.000000e+00> : vector<42x32xf32>
    %130 = tpu.matmul %127, %129, %cst_33 {dimension_numbers = #tpu.dot_dimension_numbers<[1], [0], [0], [1], [0, 0, 1, 1], [], []>} : vector<42x32xbf16>, vector<32x32xbf16>, vector<42x32xf32> -> vector<42x32xf32>
    %131 = arith.addf %3, %130 : vector<42x32xf32>
    %c0_34 = arith.constant 0 : index
    %c0_35 = arith.constant 0 : index
    %c0_36 = arith.constant 0 : index
    %132 = vector.load %arg9[%c0_34, %c0_35, %c0_36] : memref<1x1x32xf32, #tpu.memory_space<vmem>>, vector<1x1x32xf32>
    %133 = vector.shape_cast %132 : vector<1x1x32xf32> to vector<1x32xf32>
    %134 = vector.broadcast %133 : vector<1x32xf32> to vector<42x32xf32>
    %135 = arith.addf %131, %134 : vector<42x32xf32>
    %cst_37 = arith.constant dense<0.000000e+00> : vector<42xf32>
    %136 = vector.multi_reduction <add>, %135, %cst_37 [1] : vector<42x32xf32> to vector<42xf32>
    %137 = vector.shape_cast %136 : vector<42xf32> to vector<42x1xf32>
    %cst_38 = arith.constant 3.200000e+01 : f32
    %138 = vector.broadcast %cst_38 : f32 to vector<42x1xf32>
    %139 = arith.divf %137, %138 : vector<42x1xf32>
    %140 = vector.broadcast %139 : vector<42x1xf32> to vector<42x32xf32>
    %141 = arith.subf %135, %140 : vector<42x32xf32>
    %142 = arith.mulf %141, %141 : vector<42x32xf32>
    %cst_39 = arith.constant dense<0.000000e+00> : vector<42xf32>
    %143 = vector.multi_reduction <add>, %142, %cst_39 [1] : vector<42x32xf32> to vector<42xf32>
    %144 = vector.shape_cast %143 : vector<42xf32> to vector<42x1xf32>
    %cst_40 = arith.constant 3.200000e+01 : f32
    %145 = vector.broadcast %cst_40 : f32 to vector<42x1xf32>
    %146 = arith.divf %144, %145 : vector<42x1xf32>
    %147 = vector.broadcast %139 : vector<42x1xf32> to vector<42x32xf32>
    %148 = arith.subf %135, %147 : vector<42x32xf32>
    %cst_41 = arith.constant 9.99999974E-6 : f32
    %149 = vector.broadcast %cst_41 : f32 to vector<42x1xf32>
    %150 = arith.addf %146, %149 : vector<42x1xf32>
    %151 = math.rsqrt %150 : vector<42x1xf32>
    %152 = vector.broadcast %151 : vector<42x1xf32> to vector<42x32xf32>
    %153 = arith.mulf %148, %152 : vector<42x32xf32>
    %154 = vector.extract_strided_slice %5 {offsets = [0, 64], sizes = [1, 32], strides = [1, 1]} : vector<2x128xf32> to vector<1x32xf32>
    %155 = vector.extract_strided_slice %5 {offsets = [0, 96], sizes = [1, 32], strides = [1, 1]} : vector<2x128xf32> to vector<1x32xf32>
    %156 = vector.extract_strided_slice %153 {offsets = [0, 0], sizes = [21, 32], strides = [1, 1]} : vector<42x32xf32> to vector<21x32xf32>
    %cst_42 = arith.constant 1.000000e+00 : f32
    %157 = vector.broadcast %cst_42 : f32 to vector<1x32xf32>
    %158 = arith.addf %154, %157 : vector<1x32xf32>
    %159 = vector.broadcast %158 : vector<1x32xf32> to vector<21x32xf32>
    %160 = arith.mulf %156, %159 : vector<21x32xf32>
    %161 = vector.broadcast %155 : vector<1x32xf32> to vector<21x32xf32>
    %162 = arith.addf %160, %161 : vector<21x32xf32>
    %163 = vector.extract_strided_slice %5 {offsets = [1, 64], sizes = [1, 32], strides = [1, 1]} : vector<2x128xf32> to vector<1x32xf32>
    %164 = vector.extract_strided_slice %5 {offsets = [1, 96], sizes = [1, 32], strides = [1, 1]} : vector<2x128xf32> to vector<1x32xf32>
    %165 = vector.extract_strided_slice %153 {offsets = [21, 0], sizes = [21, 32], strides = [1, 1]} : vector<42x32xf32> to vector<21x32xf32>
    %cst_43 = arith.constant 1.000000e+00 : f32
    %166 = vector.broadcast %cst_43 : f32 to vector<1x32xf32>
    %167 = arith.addf %163, %166 : vector<1x32xf32>
    %168 = vector.broadcast %167 : vector<1x32xf32> to vector<21x32xf32>
    %169 = arith.mulf %165, %168 : vector<21x32xf32>
    %170 = vector.broadcast %164 : vector<1x32xf32> to vector<21x32xf32>
    %171 = arith.addf %169, %170 : vector<21x32xf32>
    %172 = tpu.concatenate %162, %171 in 0 : vector<21x32xf32>, vector<21x32xf32> -> vector<42x32xf32>
    %173 = arith.truncf %172 : vector<42x32xf32> to vector<42x32xbf16>
    %c0_44 = arith.constant 0 : index
    %c0_45 = arith.constant 0 : index
    %c0_46 = arith.constant 0 : index
    %174 = vector.load %arg10[%c0_44, %c0_45, %c0_46] : memref<1x32x64xbf16, #tpu.memory_space<vmem>>, vector<1x32x64xbf16>
    %175 = vector.shape_cast %174 : vector<1x32x64xbf16> to vector<32x64xbf16>
    %cst_47 = arith.constant dense<0.000000e+00> : vector<42x64xf32>
    %176 = tpu.matmul %173, %175, %cst_47 {dimension_numbers = #tpu.dot_dimension_numbers<[1], [0], [0], [1], [0, 0, 1, 1], [], []>} : vector<42x32xbf16>, vector<32x64xbf16>, vector<42x64xf32> -> vector<42x64xf32>
    %c0_48 = arith.constant 0 : index
    %c0_49 = arith.constant 0 : index
    %c0_50 = arith.constant 0 : index
    %177 = vector.load %arg11[%c0_48, %c0_49, %c0_50] : memref<1x1x64xf32, #tpu.memory_space<vmem>>, vector<1x1x64xf32>
    %178 = vector.shape_cast %177 : vector<1x1x64xf32> to vector<1x64xf32>
    %179 = vector.broadcast %178 : vector<1x64xf32> to vector<42x64xf32>
    %180 = arith.addf %176, %179 : vector<42x64xf32>
    %cst_51 = arith.constant 5.000000e-01 : f32
    %181 = vector.broadcast %cst_51 : f32 to vector<42x64xf32>
    %182 = arith.mulf %181, %180 : vector<42x64xf32>
    %183 = arith.mulf %180, %180 : vector<42x64xf32>
    %184 = arith.mulf %183, %180 : vector<42x64xf32>
    %cst_52 = arith.constant 4.471500e-02 : f32
    %185 = vector.broadcast %cst_52 : f32 to vector<42x64xf32>
    %186 = arith.mulf %185, %184 : vector<42x64xf32>
    %187 = arith.addf %180, %186 : vector<42x64xf32>
    %cst_53 = arith.constant 0.797884583 : f32
    %188 = vector.broadcast %cst_53 : f32 to vector<42x64xf32>
    %189 = arith.mulf %188, %187 : vector<42x64xf32>
    %190 = math.tanh %189 : vector<42x64xf32>
    %cst_54 = arith.constant 1.000000e+00 : f32
    %191 = vector.broadcast %cst_54 : f32 to vector<42x64xf32>
    %192 = arith.addf %191, %190 : vector<42x64xf32>
    %193 = arith.mulf %182, %192 : vector<42x64xf32>
    %194 = arith.truncf %193 : vector<42x64xf32> to vector<42x64xbf16>
    %c0_55 = arith.constant 0 : index
    %c0_56 = arith.constant 0 : index
    %c0_57 = arith.constant 0 : index
    %195 = vector.load %arg12[%c0_55, %c0_56, %c0_57] : memref<1x64x32xbf16, #tpu.memory_space<vmem>>, vector<1x64x32xbf16>
    %196 = vector.shape_cast %195 : vector<1x64x32xbf16> to vector<64x32xbf16>
    %cst_58 = arith.constant dense<0.000000e+00> : vector<42x32xf32>
    %197 = tpu.matmul %194, %196, %cst_58 {dimension_numbers = #tpu.dot_dimension_numbers<[1], [0], [0], [1], [0, 0, 1, 1], [], []>} : vector<42x64xbf16>, vector<64x32xbf16>, vector<42x32xf32> -> vector<42x32xf32>
    %198 = arith.addf %135, %197 : vector<42x32xf32>
    %c0_59 = arith.constant 0 : index
    %c0_60 = arith.constant 0 : index
    %c0_61 = arith.constant 0 : index
    %199 = vector.load %arg13[%c0_59, %c0_60, %c0_61] : memref<1x1x32xf32, #tpu.memory_space<vmem>>, vector<1x1x32xf32>
    %200 = vector.shape_cast %199 : vector<1x1x32xf32> to vector<1x32xf32>
    %201 = vector.broadcast %200 : vector<1x32xf32> to vector<42x32xf32>
    %202 = arith.addf %198, %201 : vector<42x32xf32>
    %c0_62 = arith.constant 0 : index
    %c0_63 = arith.constant 0 : index
    %203 = vector.load %arg17[%c0_62, %c0_63] : memref<42x32xf32, #tpu.memory_space<vmem>>, vector<42x32xf32>
    tpu.vector_store %arg17[%c0_62, %c0_63], %202 {strides = array<i32>} : memref<42x32xf32, #tpu.memory_space<vmem>>, vector<42x32xf32>,
    %c1_i32 = arith.constant 1 : i32
    %204 = arith.cmpi eq, %arg0, %c1_i32 : i32
    %205 = arith.extui %204 : i1 to i32
    %c0_i32_64 = arith.constant 0 : i32
    %206 = arith.cmpi ne, %205, %c0_i32_64 : i32
    scf.if %206 {
      %cst_65 = arith.constant dense<0.000000e+00> : vector<42xf32>
      %207 = vector.multi_reduction <add>, %202, %cst_65 [1] : vector<42x32xf32> to vector<42xf32>
      %208 = vector.shape_cast %207 : vector<42xf32> to vector<42x1xf32>
      %cst_66 = arith.constant 3.200000e+01 : f32
      %209 = vector.broadcast %cst_66 : f32 to vector<42x1xf32>
      %210 = arith.divf %208, %209 : vector<42x1xf32>
      %211 = vector.broadcast %210 : vector<42x1xf32> to vector<42x32xf32>
      %212 = arith.subf %202, %211 : vector<42x32xf32>
      %213 = arith.mulf %212, %212 : vector<42x32xf32>
      %cst_67 = arith.constant dense<0.000000e+00> : vector<42xf32>
      %214 = vector.multi_reduction <add>, %213, %cst_67 [1] : vector<42x32xf32> to vector<42xf32>
      %215 = vector.shape_cast %214 : vector<42xf32> to vector<42x1xf32>
      %cst_68 = arith.constant 3.200000e+01 : f32
      %216 = vector.broadcast %cst_68 : f32 to vector<42x1xf32>
      %217 = arith.divf %215, %216 : vector<42x1xf32>
      %218 = vector.broadcast %210 : vector<42x1xf32> to vector<42x32xf32>
      %219 = arith.subf %202, %218 : vector<42x32xf32>
      %cst_69 = arith.constant 9.99999974E-6 : f32
      %220 = vector.broadcast %cst_69 : f32 to vector<42x1xf32>
      %221 = arith.addf %217, %220 : vector<42x1xf32>
      %222 = math.rsqrt %221 : vector<42x1xf32>
      %223 = vector.broadcast %222 : vector<42x1xf32> to vector<42x32xf32>
      %224 = arith.mulf %219, %223 : vector<42x32xf32>
      %c0_70 = arith.constant 0 : index
      %c0_71 = arith.constant 0 : index
      %225 = vector.load %arg14[%c0_70, %c0_71] : memref<1x32xf32, #tpu.memory_space<vmem>>, vector<1x32xf32>
      %226 = vector.broadcast %225 : vector<1x32xf32> to vector<42x32xf32>
      %227 = arith.mulf %224, %226 : vector<42x32xf32>
      %c0_72 = arith.constant 0 : index
      %c0_73 = arith.constant 0 : index
      %228 = vector.load %arg15[%c0_72, %c0_73] : memref<1x32xf32, #tpu.memory_space<vmem>>, vector<1x32xf32>
      %229 = vector.broadcast %228 : vector<1x32xf32> to vector<42x32xf32>
      %230 = arith.addf %227, %229 : vector<42x32xf32>
      %231 = arith.truncf %230 : vector<42x32xf32> to vector<42x32xbf16>
      %c0_74 = arith.constant 0 : index
      %c0_75 = arith.constant 0 : index
      %232 = vector.load %arg16[%c0_74, %c0_75] : memref<42x32xbf16, #tpu.memory_space<vmem>>, vector<42x32xbf16>
      tpu.vector_store %arg16[%c0_74, %c0_75], %231 {strides = array<i32>} : memref<42x32xbf16, #tpu.memory_space<vmem>>, vector<42x32xbf16>,
    } else {
    }
    return
  }
  func.func @transform_0(%arg0: i32) -> (i32, i32) {
    %c0_i32 = arith.constant 0 : i32
    %c0_i32_0 = arith.constant 0 : i32
    %c0_i32_1 = arith.constant 0 : i32
    return %c0_i32, %c0_i32_0 : i32, i32
  }
  func.func @transform_1(%arg0: i32) -> (i32, i32, i32) {
    %c0_i32 = arith.constant 0 : i32
    %c0_i32_0 = arith.constant 0 : i32
    %c0_i32_1 = arith.constant 0 : i32
    return %arg0, %c0_i32, %c0_i32_0 : i32, i32, i32
  }
  func.func @transform_2(%arg0: i32) -> (i32, i32) {
    %c0_i32 = arith.constant 0 : i32
    %c0_i32_0 = arith.constant 0 : i32
    %c0_i32_1 = arith.constant 0 : i32
    return %c0_i32, %c0_i32_0 : i32, i32
  }
  func.func @transform_3(%arg0: i32) -> (i32, i32, i32) {
    %c0_i32 = arith.constant 0 : i32
    %c0_i32_0 = arith.constant 0 : i32
    %c0_i32_1 = arith.constant 0 : i32
    %c0_i32_2 = arith.constant 0 : i32
    return %c0_i32, %c0_i32_0, %c0_i32_1 : i32, i32, i32
  }
  func.func @transform_4(%arg0: i32) -> (i32, i32, i32) {
    %c0_i32 = arith.constant 0 : i32
    %c0_i32_0 = arith.constant 0 : i32
    %c0_i32_1 = arith.constant 0 : i32
    %c0_i32_2 = arith.constant 0 : i32
    return %c0_i32, %c0_i32_0, %c0_i32_1 : i32, i32, i32
  }
  func.func @transform_5(%arg0: i32) -> (i32, i32, i32) {
    %c0_i32 = arith.constant 0 : i32
    %c0_i32_0 = arith.constant 0 : i32
    %c0_i32_1 = arith.constant 0 : i32
    return %arg0, %c0_i32, %c0_i32_0 : i32, i32, i32
  }
  func.func @transform_6(%arg0: i32) -> (i32, i32, i32) {
    %c0_i32 = arith.constant 0 : i32
    %c0_i32_0 = arith.constant 0 : i32
    %c0_i32_1 = arith.constant 0 : i32
    return %arg0, %c0_i32, %c0_i32_0 : i32, i32, i32
  }
  func.func @transform_7(%arg0: i32) -> (i32, i32, i32) {
    %c0_i32 = arith.constant 0 : i32
    %c0_i32_0 = arith.constant 0 : i32
    %c0_i32_1 = arith.constant 0 : i32
    return %arg0, %c0_i32, %c0_i32_0 : i32, i32, i32
  }
  func.func @transform_8(%arg0: i32) -> (i32, i32, i32) {
    %c0_i32 = arith.constant 0 : i32
    %c0_i32_0 = arith.constant 0 : i32
    %c0_i32_1 = arith.constant 0 : i32
    return %arg0, %c0_i32, %c0_i32_0 : i32, i32, i32
  }
  func.func @transform_9(%arg0: i32) -> (i32, i32, i32) {
    %c0_i32 = arith.constant 0 : i32
    %c0_i32_0 = arith.constant 0 : i32
    %c0_i32_1 = arith.constant 0 : i32
    return %arg0, %c0_i32, %c0_i32_0 : i32, i32, i32
  }
  func.func @transform_10(%arg0: i32) -> (i32, i32, i32) {
    %c0_i32 = arith.constant 0 : i32
    %c0_i32_0 = arith.constant 0 : i32
    %c0_i32_1 = arith.constant 0 : i32
    return %arg0, %c0_i32, %c0_i32_0 : i32, i32, i32
  }
  func.func @transform_11(%arg0: i32) -> (i32, i32, i32) {
    %c0_i32 = arith.constant 0 : i32
    %c0_i32_0 = arith.constant 0 : i32
    %c0_i32_1 = arith.constant 0 : i32
    return %arg0, %c0_i32, %c0_i32_0 : i32, i32, i32
  }
  func.func @transform_12(%arg0: i32) -> (i32, i32, i32) {
    %c0_i32 = arith.constant 0 : i32
    %c0_i32_0 = arith.constant 0 : i32
    %c0_i32_1 = arith.constant 0 : i32
    return %arg0, %c0_i32, %c0_i32_0 : i32, i32, i32
  }
  func.func @transform_13(%arg0: i32) -> (i32, i32) {
    %c0_i32 = arith.constant 0 : i32
    %c0_i32_0 = arith.constant 0 : i32
    %c0_i32_1 = arith.constant 0 : i32
    return %c0_i32, %c0_i32_0 : i32, i32
  }
  func.func @transform_14(%arg0: i32) -> (i32, i32) {
    %c0_i32 = arith.constant 0 : i32
    %c0_i32_0 = arith.constant 0 : i32
    %c0_i32_1 = arith.constant 0 : i32
    return %c0_i32, %c0_i32_0 : i32, i32
  }
  func.func @transform_15(%arg0: i32) -> (i32, i32) {
    %c0_i32 = arith.constant 0 : i32
    %c0_i32_0 = arith.constant 0 : i32
    %c0_i32_1 = arith.constant 0 : i32
    return %c0_i32, %c0_i32_0 : i32, i32
  }
}

</mosaic_0001>

<bundles_post_ra>
// kernel: transformer_forward.3
= control target key start
LH: loop header
LB: loop body
LE: loop exit
PB: predicated region body
PF: predicated region fallthrough
CT: control target
= control target key end

     0   :  { %v166_v0 = vmov 0.0   ;;  %vm167_vm0 = vmmov 0   ;;  %vm49_vm1 = vcmask 261120   ;;  %s219_s1 = inlined_call_operand.vmem [shape: bf16[32,128], index: 1, kind: input, shape index: {}]   ;;  %s220_s0 = inlined_call_operand.vmem [shape: bf16[42,32], index: 0, kind: input, shape index: {}]   ;;  %s221_s2 = inlined_call_operand.vmem [shape: f32[42,128], index: 2, kind: output, shape index: {}]  }
   0x1   :  { %155 = vmatprep.subr.bf16.mxu1 %v166_v0  ;;  %v161_v1 = vld [vmem:[%s219_s1 + $0x8] sm:$0xff]   ;;  %139 = vmatprep.subr.bf16.mxu0 %v166_v0  ;;  %v162_v2 = vld [vmem:[%s219_s1] sm:$0xff]   ;;  %v165_v5 = vld [vmem:[%s220_s0 + $0x10] sm:$0x1f]  }
   0x2   :  { %147 = vmatprep.mubr.msk.bf16.mxu1 %vm167_vm0, %v166_v0  ;;  %143 = vmatprep.mubr.msk.bf16.mxu0 %vm167_vm0, %v166_v0  ;;  %v163_v3 = vld [vmem:[%s220_s0 + $0x8] sm:$0xff]   ;;  %v164_v4 = vld [vmem:[%s220_s0] sm:$0xff]  }
   0x3   :  { %157 = vmatpush3.bf16.msra.mxu1 %v161_v1  ;;  %140 = vmatpush3.bf16.msra.mxu0 %v161_v1 }
   0x4   :  { %156 = vmatprep.subr.bf16.mxu1 %v166_v0  ;;  %141 = vmatprep.subr.bf16.mxu0 %v166_v0 }
   0x7   :  { %158 = vmatpush3.bf16.msra.mxu1 %v162_v2  ;;  %142 = vmatpush3.bf16.msra.mxu0 %v162_v2 }
   0xa   :  { %148 = vmatmul.mubr.msk.bf16.vlgmr.msra.gmra.mxu1 %vm49_vm1, %v163_v3  ;;  %144 = vmatmul.mubr.msk.bf16.vlgmr.msra.gmra.mxu0 %vm49_vm1, %v164_v4 }
   0xb   :  { %151 = vmatprep.mubr.msk.bf16.mxu1 %vm167_vm0, %v166_v0 }
  0x12   :  { %152 = vmatmul.mubr.msk.bf16.gmra.mxu1 %vm49_vm1, %v165_v5 }
  0xca   :  { %v101_v6 = vpop.f32.mrf.mxu1  ;;  %v93_v7 = vpop.f32.mrf.mxu0 }
  0xcb   :  { %118 = vst [vmem:[%s221_s2 + $0x10] sm:$0xff] %v101_v6  ;;  %116 = vst [vmem:[%s221_s2] sm:$0xff] %v93_v7 }
  0xcc   :  { %v149_v8 = vpop.f32.mrf.mxu1  ;;  %v145_v9 = vpop.f32.mrf.mxu0 }
  0xce   :  { %v104_v10 = vpop.f32.mrf.mxu1  ;;  %v96_v11 = vpop.f32.mrf.mxu0 }
  0xcf   :  { %119 = vst [vmem:[%s221_s2 + $0x18] sm:$0xff] %v104_v10  ;;  %117 = vst [vmem:[%s221_s2 + $0x8] sm:$0xff] %v96_v11 }
  0xd0   :  { %v150_v12 = vpop.f32.mrf.mxu1  ;;  %v146_v13 = vpop.f32.mrf.mxu0 }
  0xd2   :  { %v109_v14 = vpop.f32.mrf.mxu1 }
  0xd3   :  { %120 = vst [vmem:[%s221_s2 + $0x20] sm:$0xff] %v109_v14 }
  0xd4   :  { %v153_v15 = vpop.f32.mrf.mxu1 }
  0xd6   :  { %v112_v16 = vpop.f32.mrf.mxu1 }
  0xd7   :  { %121 = vst [vmem:[%s221_s2 + $0x28] sm:$0x3] %v112_v16 }
  0xd8   :  { %v154_v17 = vpop.f32.mrf.mxu1 }

// kernel: transformer_forward.2
= control target key start
LH: loop header
LB: loop body
LE: loop exit
PB: predicated region body
PF: predicated region fallthrough
CT: control target
= control target key end

     0   :  { %s3259_s18 = smov 0   ;;  %s4180_s0 = inlined_call_operand.vmem [shape: f32[42,32], index: 0, kind: input, shape index: {}]   ;;  %s4181_s1 = inlined_call_operand.vmem [shape: f32[2,2,128], index: 1, kind: input, shape index: {}]   ;;  %s4182_s2 = inlined_call_operand.vmem [shape: f32[21,21], index: 2, kind: input, shape index: {}]   ;;  %s4183_s3 = inlined_call_operand.vmem [shape: f32[2,21,16], index: 3, kind: input, shape index: {}]   ;;  %s4184_s4 = inlined_call_operand.vmem [shape: f32[2,21,16], index: 4, kind: input, shape index: {}]   ;;  %s4185_s5 = inlined_call_operand.vmem [shape: bf16[2,32,96], index: 5, kind: input, shape index: {}]   ;;  %s4186_s6 = inlined_call_operand.vmem [shape: f32[2,1,96], index: 6, kind: input, shape index: {}]   ;;  %s4187_s7 = inlined_call_operand.vmem [shape: bf16[2,32,32], index: 7, kind: input, shape index: {}]   ;;  %s4188_s8 = inlined_call_operand.vmem [shape: f32[2,1,32], index: 8, kind: input, shape index: {}]   ;;  %s4189_s9 = inlined_call_operand.vmem [shape: bf16[2,32,64], index: 9, kind: input, shape index: {}]   ;;  %s4190_s10 = inlined_call_operand.vmem [shape: f32[2,1,64], index: 10, kind: input, shape index: {}]   ;;  %s4191_s11 = inlined_call_operand.vmem [shape: bf16[2,64,32], index: 11, kind: input, shape index: {}]   ;;  %s4192_s12 = inlined_call_operand.vmem [shape: f32[2,1,32], index: 12, kind: input, shape index: {}]   ;;  %s4193_s13 = inlined_call_operand.vmem [shape: f32[1,32], index: 13, kind: input, shape index: {}]   ;;  %s4194_s14 = inlined_call_operand.vmem [shape: f32[1,32], index: 14, kind: input, shape index: {}]   ;;  %s4195_s15 = inlined_call_operand.vmem [shape: bf16[42,32], index: 15, kind: output, shape index: {}]  }
   0x1   :  { %4198 = sst [smem:[#allocation4_spill]] %s4181_s1 }
   0x2   :  { %4199 = sst [smem:[#allocation5_spill]] %s4185_s5 }
   0x3   :  { %4200 = sst [smem:[#allocation6_spill]] %s4187_s7 }
   0x4   :  { %4201 = sst [smem:[#allocation7_spill]] %s4193_s13 }
   0x5   :  { %4202 = sst [smem:[#allocation8_spill]] %s4194_s14 }
   0x6   :  { %4203 = sst [smem:[#allocation9_spill]] %s4195_s15 }
   0x7 LB: > { %4204 = sst [smem:[#allocation3_spill]] %s3165_s18  ;;  %s3265_s19 = sadd.s32 4294967295, %s3165_s18   ;;  %s3165_s18 = sphi %s3259_s18, %s25_s18  }
   0x8   : > { %p2749_p0 = scmp.ge.s32.totalorder %s3165_s18, 1  ;;  %p503_p1 = scmp.lt.s32.totalorder %s3165_s18, 3 }
   0xa   : > { %p504_p2 = pnand %p2749_p0, %p503_p1 }
   0xb   : > { %p577_p3 = scmp.lt.s32.totalorder (!%p504_p2), %s3265_s19, 1  ;;  %s4205_s1 = sld [smem:[#allocation4_spill]] (!%p504_p2) }
   0xc   : > { %507 = sbr.rel (%p504_p2) target bundleno = 3354 (0xd1a), region = 80  ;;  %s4206_s5 = sld [smem:[#allocation5_spill]] (!%p504_p2) }
   0xd   : > { %s4207_s7 = sld [smem:[#allocation6_spill]] (!%p504_p2)  ;;  %p2759_p4 = scmp.ne.s32.totalorder (!%p504_p2), %s3265_s19, 0 }
  0x11   : > { %s3271_s20 = scalar_select %p577_p3, %s3265_s19, 1 }
  0x13   : > { %s2750_s21 = sshll.u32 %s3271_s20, 1  ;;  %s2813_s22 = sshll.u32 %s3271_s20, 4 }
  0x14   : > { %s3278_s25 = scalar_lea.vmem %s4205_s1, %s2750_s21  ;;  %s3283_s28 = scalar_lea.vmem %s4206_s5, %s2813_s22 }
  0x15   : > { %s3292_s15 = scalar_lea.vmem %s4207_s7, %s2813_s22  ;;  %s596_s23 = scalar_lea.vmem %s4188_s8, %s3271_s20 }
  0x16   : > { %s3301_s1 = scalar_lea.vmem %s4189_s9, %s2813_s22  ;;  %s604_s5 = scalar_lea.vmem %s4190_s10, %s3271_s20 }
  0x17   : > { %s2816_s29 = sshll.u32 %s3271_s20, 5  ;;  %s612_s13 = scalar_lea.vmem %s4192_s12, %s3271_s20 }
  0x18   : > { %s3311_s18 = scalar_lea.vmem %s4191_s11, %s2816_s29  ;;  %617 = sbr.rel (%p2759_p4) target bundleno = 34 (0x22), region = 84 }
  0x1d   : > { %v618_v0 = vld [vmem:[%s4180_s0] sm:$0xff]  ;;  %vm624_vm0 = vcmask 261120   ;;  %v619_v1 = vld [vmem:[%s4180_s0 + $0x8] sm:$0xff]  ;;  %v620_v2 = vld [vmem:[%s4180_s0 + $0x10] sm:$0xff]  ;;  %vm630_vm1 = vcmask 254976  }
  0x1e   : > { %625 = vst.msk [vmem:[#allocation2] sm:$0xff] %vm624_vm0, %v618_v0  ;;  %626 = vst.msk [vmem:[#allocation2 + $0x8] sm:$0xff] %vm624_vm0, %v619_v1  ;;  %v621_v3 = vld [vmem:[%s4180_s0 + $0x18] sm:$0xff]  ;;  %v622_v4 = vld [vmem:[%s4180_s0 + $0x20] sm:$0xff] }
  0x1f   : > { %627 = vst.msk [vmem:[#allocation2 + $0x10] sm:$0xff] %vm624_vm0, %v620_v2  ;;  %v623_v5 = vld [vmem:[%s4180_s0 + $0x28] sm:$0x3]  ;;  %628 = vst.msk [vmem:[#allocation2 + $0x18] sm:$0xff] %vm624_vm0, %v621_v3 }
  0x20   : > { %629 = vst.msk [vmem:[#allocation2 + $0x20] sm:$0xff] %vm624_vm0, %v622_v4 }
  0x21   : > { %631 = vst.msk [vmem:[#allocation2 + $0x28] sm:$0x3] %vm630_vm1, %v623_v5 }
  0x22 PF: > { %vm639_vm2 = vcmask 261120   ;;  %vm655_vm3 = vcmask 254976   ;;  %v721_v18 = vlaneseq  ;;  %v638_v19 = vld [vmem:[%s3278_s25] sm:$0x3]  ;;  %s3167_s25 = smov 96   ;;  %v3047_v58 = vld [vmem:[%s3283_s28 + $0x8] sm:$0xff]   ;;  %s4208_s21 = scalar_lea.vmem %s4186_s6, %s3271_s20 }
  0x23   : > { %v720_v20 = vadd.f32 1.0, %v638_v19  ;;  %v3168_v59 = vmov 0.0   ;;  %v3048_v60 = vld [vmem:[%s3283_s28] sm:$0xff]   ;;  %vm3169_vm4 = vmmov 0   ;;  %vm759_vm5 = vcmask 1044480   ;;  %s3170_s24 = smov 112  }
  0x24   : > { %v722_v21 = vshrl.u32 %v721_v18, 7  ;;  %2877 = vmatprep.subr.bf16.mxu1 %v3168_v59  ;;  %2881 = vmatprep.mubr.msk.bf16.mxu1 %vm3169_vm4, %v3168_v59  ;;  %vm868_vm6 = vcmask 1042432   ;;  %s3171_s26 = smov 90   ;;  %s3172_s16 = smov 102   ;;  %vm972_vm7 = vcmask 48128   ;;  %vm985_vm8 = vcmask 97280  }
  0x25   : > { %v632_v6 = vld [vmem:[#allocation2] sm:$0xff]  ;;  %v633_v8 = vld [vmem:[#allocation2 + $0x8] sm:$0xff]  ;;  %2878 = vmatpush3.bf16.msra.mxu1 %v3047_v58  ;;  %s3173_s29 = smov 32   ;;  %vm1299_vm9 = vcmask 130048   ;;  %vm1558_vm10 = vcmask 171008   ;;  %vm1565_vm11 = vcmask 167936  }
  0x26   : > { %v634_v7 = vld [vmem:[#allocation2 + $0x10] sm:$0xff]  ;;  %v640_v9 = vsel %vm639_vm2, %v632_v6, 0.0  ;;  %v635_v11 = vld [vmem:[#allocation2 + $0x18] sm:$0xff]  ;;  %v643_v13 = vsel %vm639_vm2, %v633_v8, 0.0  ;;  %v723_v22 = vsub.s32 0, %v722_v21  ;;  %v741_v24 = vsub.s32 1, %v722_v21  ;;  %2879 = vmatprep.subr.bf16.mxu1 %v3168_v59 }
  0x27   : > { %v646_v10 = vsel %vm639_vm2, %v634_v7, 0.0  ;;  %v636_v12 = vld [vmem:[#allocation2 + $0x20] sm:$0xff]  ;;  %641 = vadd.xlane.f32.xlu0 %v640_v9  ;;  %v649_v14 = vsel %vm639_vm2, %v635_v11, 0.0  ;;  %s3176_s30 = smov 64   ;;  %vm1721_vm12 = vcmask 1041408   ;;  %s3178_s17 = smov 16  }
  0x28   : > { %647 = vadd.xlane.f32.xlu1 %v646_v10  ;;  %v637_v15 = vld [vmem:[#allocation2 + $0x28] sm:$0x3]  ;;  %v652_v16 = vsel %vm639_vm2, %v636_v12, 0.0  ;;  %v3343_v23 = vrot.slane %v720_v20, %v723_v22  ;;  %v3345_v25 = vrot.slane %v720_v20, %v741_v24  ;;  %v3377_v56 = vrot.slane %v638_v19, %v741_v24  ;;  %p2802_p5 = scmp.ne.s32.totalorder %s3265_s19, 1 }
  0x29   : > { %v656_v17 = vsel %vm655_vm3, %v637_v15, 0.0  ;;  %v3379_v57 = vrot.slane %v638_v19, %v723_v22  ;;  %2880 = vmatpush3.bf16.msra.mxu1 %v3048_v60  ;;  %vm2402_vm13 = vcmask 523264   ;;  %s4211_s22 = sld [smem:[#allocation9_spill]] (!%p2802_p5) }
  0x2b   : > { %644 = vadd.xlane.f32.xlu0 %v643_v13 }
  0x2c   : > { %650 = vadd.xlane.f32.xlu1 %v649_v14 }
  0x2f   : > { %653 = vadd.xlane.f32.xlu0 %v652_v16 }
  0x30   : > { %657 = vadd.xlane.f32.xlu1 %v656_v17 }
  0xb0   : > { %v642_v26 = vpop.xlane.xlu0 %641 }
  0xb1   : > { %v648_v27 = vpop.xlane.xlu1 %647  ;;  %v660_v28 = vmul.f32 0.03125, %v642_v26 }
  0xb2   : > { %v662_v29 = vmul.f32 0.03125, %v648_v27 }
  0xb3   : > { %v3347_v30 = vsub.f32 %v632_v6, %v660_v28 }
  0xb4   : > { %v3349_v31 = vsub.f32 %v634_v7, %v662_v29  ;;  %v645_v32 = vpop.xlane.xlu0 %644 }
  0xb5   : > { %v651_v33 = vpop.xlane.xlu1 %650  ;;  %v661_v34 = vmul.f32 0.03125, %v645_v32  ;;  %v672_v36 = vmul.f32 %v3347_v30, %v3347_v30 }
  0xb6   : > { %v663_v35 = vmul.f32 0.03125, %v651_v33  ;;  %v674_v37 = vmul.f32 %v3349_v31, %v3349_v31 }
  0xb7   : > { %v3355_v38 = vsub.f32 %v633_v8, %v661_v34  ;;  %v678_v40 = vsel %vm639_vm2, %v672_v36, 0.0 }
  0xb8   : > { %v3357_v39 = vsub.f32 %v635_v11, %v663_v35  ;;  %679 = vadd.xlane.f32.xlu0 %v678_v40  ;;  %v654_v41 = vpop.xlane.xlu0 %653  ;;  %v684_v43 = vsel %vm639_vm2, %v674_v37, 0.0 }
  0xb9   : > { %v658_v42 = vpop.xlane.xlu1 %657  ;;  %v664_v44 = vmul.f32 0.03125, %v654_v41  ;;  %v673_v46 = vmul.f32 %v3355_v38, %v3355_v38 }
  0xba   : > { %v665_v45 = vmul.f32 0.03125, %v658_v42  ;;  %v675_v47 = vmul.f32 %v3357_v39, %v3357_v39 }
  0xbb   : > { %v3365_v48 = vsub.f32 %v636_v12, %v664_v44  ;;  %v681_v50 = vsel %vm639_vm2, %v673_v46, 0.0 }
  0xbc   : > { %v3367_v49 = vsub.f32 %v637_v15, %v665_v45  ;;  %685 = vadd.xlane.f32.xlu0 %v684_v43  ;;  %682 = vadd.xlane.f32.xlu1 %v681_v50  ;;  %v687_v51 = vsel %vm639_vm2, %v675_v47, 0.0 }
  0xbd   : > { %v676_v52 = vmul.f32 %v3365_v48, %v3365_v48 }
  0xbe   : > { %v677_v53 = vmul.f32 %v3367_v49, %v3367_v49 }
  0xbf   : > { %v690_v54 = vsel %vm639_vm2, %v676_v52, 0.0 }
  0xc0   : > { %688 = vadd.xlane.f32.xlu1 %v687_v51  ;;  %691 = vadd.xlane.f32.xlu0 %v690_v54  ;;  %v693_v55 = vsel %vm655_vm3, %v677_v53, 0.0 }
  0xc4   : > { %694 = vadd.xlane.f32.xlu1 %v693_v55 }
  0xd5   : > { %752 = vrot.lane.b32.xlu1 %v3377_v56, %s3167_s25 }
  0xd6   : > { %733 = vrot.lane.b32.xlu0 %v3379_v57, %s3167_s25 }
 0x141   : > { %v680_v61 = vpop.xlane.xlu0 %679 }
 0x142   : > { %v696_v62 = vmul.f32 0.03125, %v680_v61 }
 0x144   : > { %v702_v63 = vadd.f32 1e-05, %v696_v62 }
 0x145   : > { %v683_v0 = vpop.xlane.xlu1 %682  ;;  %v686_v1 = vpop.xlane.xlu0 %685 }
 0x146   : > { %3057 = vrsqrt.f32 %v702_v63  ;;  %v697_v2 = vmul.f32 0.03125, %v683_v0  ;;  %v698_v3 = vmul.f32 0.03125, %v686_v1 }
 0x148   : > { %v703_v4 = vadd.f32 1e-05, %v697_v2  ;;  %v704_v5 = vadd.f32 1e-05, %v698_v3 }
 0x149   : > { %v689_v6 = vpop.xlane.xlu1 %688  ;;  %v692_v7 = vpop.xlane.xlu0 %691 }
 0x14a   : > { %3059 = vrsqrt.f32 %v703_v4  ;;  %v699_v8 = vmul.f32 0.03125, %v689_v6  ;;  %v700_v10 = vmul.f32 0.03125, %v692_v7 }
 0x14b   : > { %3061 = vrsqrt.f32 %v704_v5 }
 0x14c   : > { %v705_v9 = vadd.f32 1e-05, %v699_v8  ;;  %v706_v13 = vadd.f32 1e-05, %v700_v10 }
 0x14d   : > { %v695_v11 = vpop.xlane.xlu1 %694  ;;  %v734_v22 = vpop.permute.xlu0 %733 }
 0x14e   : > { %3063 = vrsqrt.f32 %v705_v9  ;;  %v701_v12 = vmul.f32 0.03125, %v695_v11 }
 0x150   : > { %v707_v14 = vadd.f32 1e-05, %v701_v12 }
 0x151   : > { %v753_v34 = vpop.permute.xlu1 %752 }
 0x152   : > { %3065 = vrsqrt.f32 %v707_v14 }
 0x153   : > { %v3058_v15 = vpop.eup %3057  ;;  %3067 = vrsqrt.f32 %v706_v13 }
 0x154   : > { %v714_v16 = vmul.f32 %v3058_v15, %v3347_v30 }
 0x156   : > { %v725_v20 = vmul.f32 %v3343_v23, %v714_v16 }
 0x157   : > { %v3060_v17 = vpop.eup %3059 }
 0x158   : > { %v3062_v18 = vpop.eup %3061  ;;  %v715_v19 = vmul.f32 %v3060_v17, %v3355_v38  ;;  %v736_v27 = vadd.f32 %v734_v22, %v725_v20 }
 0x159   : > { %v716_v21 = vmul.f32 %v3062_v18, %v3349_v31 }
 0x15a   : > { %v726_v24 = vmul.f32 %v3343_v23, %v715_v19 }
 0x15b   : > { %v3064_v26 = vpop.eup %3063  ;;  %v727_v32 = vmul.f32 %v3343_v23, %v716_v21  ;;  %v743_v30 = vmul.f32 %v3345_v25, %v716_v21 }
 0x15c   : > { %v737_v28 = vadd.f32 %v734_v22, %v726_v24  ;;  %v717_v29 = vmul.f32 %v3064_v26, %v3357_v39  ;;  %v3512_v24 = vld [vmem:[%s4183_s3 + $0x28] sm:$0x1f] }
 0x15d   : > { %v738_v37 = vadd.f32 %v734_v22, %v727_v32  ;;  %v755_v38 = vadd.f32 %v753_v34, %v743_v30  ;;  %v3528_v32 = vld [vmem:[%s4183_s3 + $0x10] sm:$0x1f]  ;;  %v3533_v30 = vld [vmem:[%s4183_s3 + $0x8] sm:$0xff] }
 0x15e   : > { %v744_v33 = vmul.f32 %v3345_v25, %v717_v29  ;;  %v761_v35 = vpack.c.bf16 %v737_v28, %v736_v27  ;;  %v3522_v28 = vld [vmem:[%s4184_s4 + $0x10] sm:$0x1f] }
 0x15f   : > { %v3066_v36 = vpop.eup %3065  ;;  %v760_v42 = vsel %vm759_vm5, %v738_v37, %v755_v38  ;;  %v3559_v38 = vld [vmem:[%s4184_s4] sm:$0xff] }
 0x160   : > { %2882 = vmatmul.mubr.msk.bf16.vlgmr.msra.gmra.mxu1 %vm639_vm2, %v761_v35  ;;  %v3068_v31 = vpop.eup %3067  ;;  %v719_v40 = vmul.f32 %v3066_v36, %v3367_v49  ;;  %v756_v39 = vadd.f32 %v753_v34, %v744_v33  ;;  %v3543_v35 = vld [vmem:[%s4183_s3 + $0x20] sm:$0xff] }
 0x161   : > { %2885 = vmatprep.mubr.msk.bf16.mxu1 %vm3169_vm4, %v3168_v59  ;;  %v718_v41 = vmul.f32 %v3068_v31, %v3365_v48  ;;  %v2760_v48 = vld [vmem:[%s4208_s21] ss:$0 sm:$0xff] }
 0x162   : > { %v746_v43 = vmul.f32 %v3345_v25, %v719_v40  ;;  %v762_v44 = vpack.c.bf16 %v756_v39, %v760_v42  ;;  %v3551_v36 = vld [vmem:[%s4183_s3] sm:$0xff]  ;;  %v3565_v39 = vld [vmem:[%s4183_s3 + $0x18] sm:$0xff] }
 0x163   : > { %v745_v45 = vmul.f32 %v3345_v25, %v718_v41 }
 0x164   : > { %v758_v46 = vadd.f32 %v753_v34, %v746_v43 }
 0x165   : > { %v757_v47 = vadd.f32 %v753_v34, %v745_v45 }
 0x167   : > { %v763_v49 = vpack.c.bf16 %v758_v46, %v757_v47 }
 0x168   : > { %2886 = vmatmul.mubr.msk.bf16.gmra.mxu1 %vm639_vm2, %v762_v44 }
 0x169   : > { %2889 = vmatprep.mubr.msk.bf16.mxu1 %vm3169_vm4, %v3168_v59 }
 0x170   : > { %2890 = vmatmul.mubr.msk.bf16.gmra.mxu1 %vm639_vm2, %v763_v49 }
 0x220   : > { %v830_v50 = vpop.f32.mrf.mxu1 }
 0x221   : > { %v3425_v62 = vadd.f32 %v2760_v48, %v830_v50 }
 0x222   : > { %v2883_v51 = vpop.f32.mrf.mxu1 }
 0x223   : > { %v3576_v51 = vld [vmem:[%s4184_s4 + $0x18] sm:$0xff] }
 0x224   : > { %v833_v52 = vpop.f32.mrf.mxu1 }
 0x225   : > { %v3417_v53 = vadd.f32 %v2760_v48, %v833_v52 }
 0x226   : > { %v2884_v54 = vpop.f32.mrf.mxu1 }
 0x227   : > { %858 = vrot.lane.b32.xlu0 %v3417_v53, %s3170_s24 }
 0x228   : > { %v838_v55 = vpop.f32.mrf.mxu1 }
 0x229   : > { %v3421_v58 = vadd.f32 %v2760_v48, %v838_v55 }
 0x22a   : > { %v2887_v60 = vpop.f32.mrf.mxu1 }
 0x22b   : > { %860 = vrot.lane.b32.xlu1 %v3421_v58, %s3170_s24  ;;  %v869_v1 = vrot.slane %v3421_v58, 5 }
 0x22c   : > { %v841_v61 = vpop.f32.mrf.mxu1 }
 0x22d   : > { %v842_v63 = vadd.f32 %v2760_v48, %v841_v61  ;;  %v3584_v61 = vld [vmem:[%s4184_s4 + $0x8] sm:$0xff] }
 0x22e   : > { %v2888_v0 = vpop.f32.mrf.mxu1 }
 0x22f   : > { %v870_v2 = vrot.slane %v842_v63, 5  ;;  %856 = vrot.lane.b32.xlu1 %v3425_v62, %s3170_s24 }
 0x230   : > { %v846_v3 = vpop.f32.mrf.mxu1 }
 0x231   : > { %v3431_v4 = vsel %vm868_vm6, %v869_v1, %v870_v2  ;;  %v847_v6 = vadd.f32 %v2760_v48, %v846_v3  ;;  %v3593_v3 = vld [vmem:[%s4184_s4 + $0x20] sm:$0xff] }
 0x232   : > { %879 = vrot.lane.b32.xlu0 %v3431_v4, %s3170_s24  ;;  %v2891_v5 = vpop.f32.mrf.mxu1 }
 0x233   : > { %v872_v10 = vrot.slane %v847_v6, 5 }
 0x234   : > { %v849_v7 = vpop.f32.mrf.mxu1 }
 0x235   : > { %v850_v8 = vadd.f32 %v2760_v48, %v849_v7  ;;  %v3445_v13 = vsel %vm868_vm6, %v870_v2, %v872_v10 }
 0x236   : > { %1038 = vrot.lane.b32.xlu0 %v3421_v58, %s3171_s26  ;;  %v2892_v9 = vpop.f32.mrf.mxu1 }
 0x237   : > { %v874_v11 = vrot.slane %v850_v8, 5 }
 0x239   : > { %v3438_v12 = vsel %vm868_vm6, %v872_v10, %v874_v11  ;;  %v3605_v11 = vld [vmem:[%s4184_s4 + $0x28] sm:$0x1f] }
 0x23a   : > { %1074 = vrot.lane.b32.xlu0 %v3421_v58, %s3172_s16  ;;  %883 = vrot.lane.b32.xlu1 %v3438_v12, %s3170_s24 }
 0x23e   : > { %1110 = vrot.lane.b32.xlu0 %v3421_v58, %s3167_s25  ;;  %881 = vrot.lane.b32.xlu1 %v3445_v13, %s3170_s24 }
 0x242   : > { %1034 = vrot.lane.b32.xlu0 %v3425_v62, %s3171_s26  ;;  %1036 = vrot.lane.b32.xlu1 %v3417_v53, %s3171_s26 }
 0x246   : > { %1070 = vrot.lane.b32.xlu0 %v3425_v62, %s3172_s16  ;;  %1072 = vrot.lane.b32.xlu1 %v3417_v53, %s3172_s16 }
 0x24a   : > { %1106 = vrot.lane.b32.xlu0 %v3425_v62, %s3167_s25 }
 0x299   : > { %v3461_v14 = vpop.permute.xlu0 %858 }
 0x29a   : > { %1042 = vrot.lane.b32.xlu1 %v3461_v14, %s3171_s26 }
 0x29d   : > { %v3465_v15 = vpop.permute.xlu1 %860 }
 0x29e   : > { %1078 = vrot.lane.b32.xlu1 %v3461_v14, %s3172_s16 }
 0x2a1   : > { %v3469_v16 = vpop.permute.xlu1 %856 }
 0x2a2   : > { %1040 = vrot.lane.b32.xlu0 %v3469_v16, %s3171_s26  ;;  %1044 = vrot.lane.b32.xlu1 %v3465_v15, %s3171_s26 }
 0x2a4   : > { %v3479_v17 = vpop.permute.xlu0 %879 }
 0x2a6   : > { %1076 = vrot.lane.b32.xlu0 %v3469_v16, %s3172_s16  ;;  %1080 = vrot.lane.b32.xlu1 %v3465_v15, %s3172_s16 }
 0x2a8   : > { %v1039_v19 = vpop.permute.xlu0 %1038 }
 0x2aa   : > { %1112 = vrot.lane.b32.xlu0 %v3469_v16, %s3167_s25  ;;  %1116 = vrot.lane.b32.xlu1 %v3465_v15, %s3167_s25 }
 0x2ac   : > { %v3485_v18 = vpop.permute.xlu1 %883  ;;  %v1075_v21 = vpop.permute.xlu0 %1074 }
 0x2ad   : > { %v1144_v27 = vsel %vm972_vm7, %v1039_v19, %v1075_v21 }
 0x2ae   : > { %1108 = vrot.lane.b32.xlu1 %v3417_v53, %s3167_s25  ;;  %1056 = vrot.lane.b32.xlu0 %v3485_v18, %s3171_s26 }
 0x2b0   : > { %v3491_v20 = vpop.permute.xlu1 %881  ;;  %v1111_v22 = vpop.permute.xlu0 %1110 }
 0x2b1   : > { %v1156_v29 = vsel %vm985_vm8, %v1144_v27, %v1111_v22 }
 0x2b2   : > { %1114 = vrot.lane.b32.xlu1 %v3461_v14, %s3167_s25  ;;  %1054 = vrot.lane.b32.xlu0 %v3491_v20, %s3171_s26  ;;  %v1204_v33 = vmul.f32 %v1156_v29, %v3522_v28 }
 0x2b4   : > { %v1035_v26 = vpop.permute.xlu0 %1034  ;;  %v1037_v42 = vpop.permute.xlu1 %1036 }
 0x2b6   : > { %1092 = vrot.lane.b32.xlu1 %v3485_v18, %s3172_s16  ;;  %1128 = vrot.lane.b32.xlu0 %v3485_v18, %s3167_s25 }
 0x2b8   : > { %v1071_v34 = vpop.permute.xlu0 %1070  ;;  %v1073_v43 = vpop.permute.xlu1 %1072 }
 0x2b9   : > { %v1142_v37 = vsel %vm972_vm7, %v1035_v26, %v1071_v34  ;;  %v1143_v63 = vsel %vm972_vm7, %v1037_v42, %v1073_v43 }
 0x2ba   : > { %1052 = vrot.lane.b32.xlu1 %v3479_v17, %s3171_s26  ;;  %1090 = vrot.lane.b32.xlu0 %v3491_v20, %s3172_s16 }
 0x2bc   : > { %v1107_v31 = vpop.permute.xlu0 %1106 }
 0x2bd   : > { %v1154_v40 = vsel %vm985_vm8, %v1142_v37, %v1107_v31 }
 0x2be   : > { %1088 = vrot.lane.b32.xlu1 %v3479_v17, %s3172_s16  ;;  %1126 = vrot.lane.b32.xlu0 %v3491_v20, %s3167_s25  ;;  %v1202_v41 = vmul.f32 %v1154_v40, %v3559_v38 }
 0x2c2   : > { %1124 = vrot.lane.b32.xlu1 %v3479_v17, %s3167_s25  ;;  %1182 = vrot.lane.b32.xlu0 %v3512_v24, %s3173_s29 }
 0x2c6   : > { %1176 = vrot.lane.b32.xlu1 %v3528_v32, %s3173_s29  ;;  %1174 = vrot.lane.b32.xlu0 %v3533_v30, %s3173_s29 }
 0x2ca   : > { %1230 = vrot.lane.b32.xlu1 %v1204_v33, %s3173_s29  ;;  %1180 = vrot.lane.b32.xlu0 %v3543_v35, %s3173_s29 }
 0x2ce   : > { %1172 = vrot.lane.b32.xlu1 %v3551_v36, %s3173_s29 }
 0x2d2   : > { %1178 = vrot.lane.b32.xlu1 %v3565_v39, %s3173_s29 }
 0x2d6   : > { %1226 = vrot.lane.b32.xlu1 %v1202_v41, %s3173_s29 }
 0x2da   : > { %1050 = vrot.lane.b32.xlu1 %v3438_v12, %s3171_s26 }
 0x30c   : > { %v1043_v44 = vpop.permute.xlu1 %1042 }
 0x310   : > { %v1079_v45 = vpop.permute.xlu1 %1078 }
 0x311   : > { %v1146_v5 = vsel %vm972_vm7, %v1043_v44, %v1079_v45 }
 0x314   : > { %v1041_v46 = vpop.permute.xlu0 %1040  ;;  %v1045_v47 = vpop.permute.xlu1 %1044 }
 0x318   : > { %v1077_v49 = vpop.permute.xlu0 %1076  ;;  %v1081_v50 = vpop.permute.xlu1 %1080 }
 0x319   : > { %v1145_v48 = vsel %vm972_vm7, %v1041_v46, %v1077_v49  ;;  %v1147_v9 = vsel %vm972_vm7, %v1045_v47, %v1081_v50 }
 0x31c   : > { %v1113_v52 = vpop.permute.xlu0 %1112  ;;  %v1117_v54 = vpop.permute.xlu1 %1116 }
 0x31d   : > { %v1157_v55 = vsel %vm985_vm8, %v1145_v48, %v1113_v52  ;;  %v1159_v19 = vsel %vm985_vm8, %v1147_v9, %v1117_v54 }
 0x31e   : > { %v1205_v60 = vmul.f32 %v1157_v55, %v3576_v51  ;;  %v1207_v22 = vmul.f32 %v1159_v19, %v3605_v11 }
 0x320   : > { %1232 = vrot.lane.b32.xlu1 %v1205_v60, %s3173_s29  ;;  %v1109_v0 = vpop.permute.xlu1 %1108  ;;  %v1057_v6 = vpop.permute.xlu0 %1056 }
 0x321   : > { %v1155_v1 = vsel %vm985_vm8, %v1143_v63, %v1109_v0 }
 0x322   : > { %v1203_v2 = vmul.f32 %v1155_v1, %v3584_v61 }
 0x324   : > { %1122 = vrot.lane.b32.xlu1 %v3438_v12, %s3167_s25  ;;  %1228 = vrot.lane.b32.xlu0 %v1203_v2, %s3173_s29  ;;  %v1115_v7 = vpop.permute.xlu1 %1114  ;;  %v1055_v26 = vpop.permute.xlu0 %1054 }
 0x325   : > { %v1158_v8 = vsel %vm985_vm8, %v1146_v5, %v1115_v7 }
 0x326   : > { %v1206_v10 = vmul.f32 %v1158_v8, %v3593_v3 }
 0x328   : > { %1046 = vrot.lane.b32.xlu1 %v3431_v4, %s3171_s26  ;;  %1234 = vrot.lane.b32.xlu0 %v1206_v10, %s3173_s29  ;;  %v1093_v21 = vpop.permute.xlu1 %1092  ;;  %v1129_v29 = vpop.permute.xlu0 %1128 }
 0x329   : > { %v1153_v34 = vsel %vm972_vm7, %v1057_v6, %v1093_v21 }
 0x32a   : > { %v1165_v43 = vsel %vm985_vm8, %v1153_v34, %v1129_v29 }
 0x32b   : > { %v1213_v45 = vmul.f32 %v1165_v43, %v3605_v11 }
 0x32c   : > { %1082 = vrot.lane.b32.xlu1 %v3431_v4, %s3172_s16  ;;  %1236 = vrot.lane.b32.xlu0 %v1207_v22, %s3173_s29  ;;  %v1053_v27 = vpop.permute.xlu1 %1052  ;;  %v1091_v41 = vpop.permute.xlu0 %1090 }
 0x32d   : > { %v1152_v48 = vsel %vm972_vm7, %v1055_v26, %v1091_v41 }
 0x330   : > { %1118 = vrot.lane.b32.xlu1 %v3431_v4, %s3167_s25  ;;  %1086 = vrot.lane.b32.xlu0 %v3438_v12, %s3172_s16  ;;  %v1089_v33 = vpop.permute.xlu1 %1088  ;;  %v1127_v47 = vpop.permute.xlu0 %1126 }
 0x331   : > { %v1151_v31 = vsel %vm972_vm7, %v1053_v27, %v1089_v33  ;;  %v1164_v52 = vsel %vm985_vm8, %v1152_v48, %v1127_v47 }
 0x332   : > { %v1212_v55 = vmul.f32 %v1164_v52, %v3593_v3 }
 0x334   : > { %1048 = vrot.lane.b32.xlu0 %v3445_v13, %s3171_s26  ;;  %v1125_v37 = vpop.permute.xlu1 %1124  ;;  %s3174_s26 = smov 122   ;;  %v1183_v0 = vpop.permute.xlu0 %1182 }
 0x335   : > { %v1163_v40 = vsel %vm985_vm8, %v1151_v31, %v1125_v37 }
 0x336   : > { %v1211_v42 = vmul.f32 %v1163_v40, %v3576_v51  ;;  %v1195_v40 = vmul.f32 %v1183_v0, %v3465_v15 }
 0x338   : > { %1084 = vrot.lane.b32.xlu0 %v3445_v13, %s3172_s16  ;;  %1244 = vrot.lane.b32.xlu1 %v1211_v42, %s3173_s29  ;;  %v3629_v44 = vpop.permute.xlu1 %1176  ;;  %s3175_s16 = smov 6   ;;  %v3664_v2 = vpop.permute.xlu0 %1174 }
 0x339   : > { %v1192_v46 = vmul.f32 %v3629_v44, %v3421_v58  ;;  %v1191_v8 = vmul.f32 %v3664_v2, %v3417_v53 }
 0x33c   : > { %1248 = vrot.lane.b32.xlu0 %v1213_v45, %s3173_s29  ;;  %v1231_v49 = vpop.permute.xlu1 %1230  ;;  %v1181_v6 = vpop.permute.xlu0 %1180 }
 0x33d   : > { %v1264_v50 = vadd.f32 %v1231_v49, %v1192_v46  ;;  %v1194_v26 = vmul.f32 %v1181_v6, %v3461_v14 }
 0x33f   : > { %v1283_v54 = vpack.c.bf16 %v1264_v50, %v1264_v50 }
 0x340   : > { %1120 = vrot.lane.b32.xlu0 %v3445_v13, %s3167_s25  ;;  %v3662_v60 = vpop.permute.xlu1 %1172 }
 0x341   : > { %1297 = vrot.lane.b32.xlu1 %v1283_v54, %s3167_s25  ;;  %v1190_v9 = vmul.f32 %v3662_v60, %v3425_v62 }
 0x344   : > { %1246 = vrot.lane.b32.xlu0 %v1212_v55, %s3173_s29  ;;  %v1179_v63 = vpop.permute.xlu1 %1178 }
 0x345   : > { %900 = vrot.lane.b32.xlu1 %v3425_v62, %s3174_s26  ;;  %v1193_v27 = vmul.f32 %v1179_v63, %v3469_v16 }
 0x348   : > { %902 = vrot.lane.b32.xlu0 %v3417_v53, %s3174_s26  ;;  %v1227_v1 = vpop.permute.xlu1 %1226 }
 0x349   : > { %936 = vrot.lane.b32.xlu1 %v3425_v62, %s3175_s16  ;;  %v1262_v21 = vadd.f32 %v1227_v1, %v1190_v9 }
 0x34c   : > { %938 = vrot.lane.b32.xlu0 %v3417_v53, %s3175_s16  ;;  %v1051_v5 = vpop.permute.xlu1 %1050 }
 0x34d   : > { %904 = vrot.lane.b32.xlu1 %v3421_v58, %s3174_s26 }
 0x350   : > { %906 = vrot.lane.b32.xlu0 %v3469_v16, %s3174_s26 }
 0x351   : > { %908 = vrot.lane.b32.xlu1 %v3461_v14, %s3174_s26 }
 0x354   : > { %940 = vrot.lane.b32.xlu0 %v3421_v58, %s3175_s16 }
 0x355   : > { %942 = vrot.lane.b32.xlu1 %v3469_v16, %s3175_s16 }
 0x358   : > { %944 = vrot.lane.b32.xlu0 %v3461_v14, %s3175_s16 }
 0x392   : > { %v1233_v7 = vpop.permute.xlu1 %1232 }
 0x393   : > { %v1265_v31 = vadd.f32 %v1233_v7, %v1193_v27 }
 0x396   : > { %v1229_v10 = vpop.permute.xlu0 %1228  ;;  %v1123_v19 = vpop.permute.xlu1 %1122 }
 0x397   : > { %v1263_v22 = vadd.f32 %v1229_v10, %v1191_v8 }
 0x399   : > { %v1282_v29 = vpack.c.bf16 %v1263_v22, %v1262_v21 }
 0x39a   : > { %v1235_v33 = vpop.permute.xlu0 %1234  ;;  %v1047_v34 = vpop.permute.xlu1 %1046 }
 0x39b   : > { %v1266_v37 = vadd.f32 %v1235_v33, %v1194_v26  ;;  %1295 = vrot.lane.b32.xlu1 %v1282_v29, %s3167_s25  ;;  %v1199_v29 = vmul.f32 %v1179_v63, %v3479_v17  ;;  %v1200_v33 = vmul.f32 %v1181_v6, %v3491_v20 }
 0x39d   : > { %v1284_v41 = vpack.c.bf16 %v1266_v37, %v1265_v31 }
 0x39e   : > { %v1237_v42 = vpop.permute.xlu0 %1236  ;;  %v1083_v43 = vpop.permute.xlu1 %1082 }
 0x39f   : > { %v1267_v45 = vadd.f32 %v1237_v42, %v1195_v40  ;;  %910 = vrot.lane.b32.xlu1 %v3465_v15, %s3174_s26  ;;  %1362 = vrot.lane.b32.xlu0 %v1284_v41, %s3167_s25  ;;  %v1148_v52 = vsel %vm972_vm7, %v1047_v34, %v1083_v43  ;;  %v1201_v34 = vmul.f32 %v1183_v0, %v3485_v18 }
 0x3a1   : > { %v1285_v46 = vpack.c.bf16 %v1267_v45, %v1267_v45 }
 0x3a2   : > { %v1087_v47 = vpop.permute.xlu0 %1086  ;;  %v1119_v50 = vpop.permute.xlu1 %1118 }
 0x3a3   : > { %v1150_v49 = vsel %vm972_vm7, %v1051_v5, %v1087_v47  ;;  %1364 = vrot.lane.b32.xlu0 %v1285_v46, %s3167_s25  ;;  %v1160_v55 = vsel %vm985_vm8, %v1148_v52, %v1119_v50 }
 0x3a4   : > { %v1162_v48 = vsel %vm985_vm8, %v1150_v49, %v1123_v19  ;;  %v1208_v7 = vmul.f32 %v1160_v55, %v3559_v38  ;;  %v998_v55 = vmul.f32 %v3551_v36, %v3425_v62 }
 0x3a5   : > { %v1210_v54 = vmul.f32 %v1162_v48, %v3522_v28 }
 0x3a6   : > { %v1049_v1 = vpop.permute.xlu0 %1048 }
 0x3a7   : > { %946 = vrot.lane.b32.xlu0 %v3465_v15, %s3175_s16  ;;  %1242 = vrot.lane.b32.xlu1 %v1210_v54, %s3173_s29  ;;  %v999_v54 = vmul.f32 %v3533_v30, %v3417_v53 }
 0x3aa   : > { %v1085_v5 = vpop.permute.xlu0 %1084  ;;  %v1245_v9 = vpop.permute.xlu1 %1244 }
 0x3ab   : > { %1238 = vrot.lane.b32.xlu1 %v1208_v7, %s3173_s29  ;;  %v1149_v10 = vsel %vm972_vm7, %v1049_v1, %v1085_v5  ;;  %v1271_v37 = vadd.f32 %v1245_v9, %v1199_v29 }
 0x3ae   : > { %v1249_v8 = vpop.permute.xlu0 %1248 }
 0x3af   : > { %918 = vrot.lane.b32.xlu1 %v3479_v17, %s3174_s26  ;;  %v1273_v42 = vadd.f32 %v1249_v8, %v1201_v34 }
 0x3b1   : > { %v1289_v6 = vpack.c.bf16 %v1273_v42, %v1273_v42 }
 0x3b2   : > { %v1121_v19 = vpop.permute.xlu0 %1120 }
 0x3b3   : > { %v1161_v21 = vsel %vm985_vm8, %v1149_v10, %v1121_v19  ;;  %954 = vrot.lane.b32.xlu1 %v3479_v17, %s3175_s16  ;;  %v1298_v22 = vpop.permute.xlu1 %1297 }
 0x3b4   : > { %v1209_v26 = vmul.f32 %v1161_v21, %v3584_v61  ;;  %v1310_v27 = vsel %vm1299_vm9, %v1298_v22, 0  ;;  %3009 = vmatprep.subr.msk.bf16.mxu1 %vm1299_vm9, %v1298_v22 }
 0x3b5   : > { %2894 = vmatpush3.bf16.xpose.msra.mxu1 %v1310_v27 }
 0x3b6   : > { %v1247_v31 = vpop.permute.xlu0 %1246  ;;  %1240 = vrot.lane.b32.xlu0 %v1209_v26, %s3173_s29 }
 0x3b7   : > { %v1272_v40 = vadd.f32 %v1247_v31, %v1200_v33  ;;  %922 = vrot.lane.b32.xlu1 %v3485_v18, %s3174_s26  ;;  %v901_v41 = vpop.permute.xlu1 %900 }
 0x3b9   : > { %v1288_v43 = vpack.c.bf16 %v1272_v40, %v1271_v37  ;;  %v1002_v37 = vmul.f32 %v3543_v35, %v3461_v14  ;;  %v1001_v40 = vmul.f32 %v3565_v39, %v3469_v16 }
 0x3ba   : > { %v903_v45 = vpop.permute.xlu0 %902  ;;  %920 = vrot.lane.b32.xlu0 %v3491_v20, %s3174_s26 }
 0x3bb   : > { %1494 = vrot.lane.b32.xlu1 %v1288_v43, %s3167_s25  ;;  %v937_v63 = vpop.permute.xlu1 %936 }
 0x3bc   : > { %v973_v0 = vsel %vm972_vm7, %v901_v41, %v937_v63 }
 0x3bd   : > { %v986_v46 = vsel %vm985_vm8, %v973_v0, %v3425_v62 }
 0x3be   : > { %v939_v47 = vpop.permute.xlu0 %938  ;;  %1496 = vrot.lane.b32.xlu0 %v1289_v6, %s3167_s25  ;;  %v1010_v49 = vmul.f32 %v986_v46, %v3559_v38  ;;  %v1000_v46 = vmul.f32 %v3528_v32, %v3421_v58 }
 0x3bf   : > { %v974_v50 = vsel %vm972_vm7, %v903_v45, %v939_v47  ;;  %912 = vrot.lane.b32.xlu1 %v3431_v4, %s3174_s26  ;;  %v905_v48 = vpop.permute.xlu1 %904 }
 0x3c0   : > { %v987_v52 = vsel %vm985_vm8, %v974_v50, %v3417_v53  ;;  %v1022_v5 = vadd.f32 %v1010_v49, %v998_v55 }
 0x3c1   : > { %v1011_v1 = vmul.f32 %v987_v52, %v3584_v61 }
 0x3c2   : > { %v907_v7 = vpop.permute.xlu0 %906  ;;  %956 = vrot.lane.b32.xlu0 %v3491_v20, %s3175_s16 }
 0x3c3   : > { %v1023_v8 = vadd.f32 %v1011_v1, %v999_v54  ;;  %948 = vrot.lane.b32.xlu1 %v3431_v4, %s3175_s16  ;;  %v909_v9 = vpop.permute.xlu1 %908  ;;  %v1198_v1 = vmul.f32 %v3629_v44, %v3438_v12 }
 0x3c5   : > { %v1274_v10 = vpack.c.bf16 %v1023_v8, %v1022_v5 }
 0x3c6   : > { %v941_v19 = vpop.permute.xlu0 %940  ;;  %958 = vrot.lane.b32.xlu0 %v3485_v18, %s3175_s16 }
 0x3c7   : > { %v975_v21 = vsel %vm972_vm7, %v905_v48, %v941_v19  ;;  %916 = vrot.lane.b32.xlu1 %v3438_v12, %s3174_s26  ;;  %2897 = vmatprep.mubr.msk.bf16.mxu1 %vm1299_vm9, %v1274_v10  ;;  %v943_v22 = vpop.permute.xlu1 %942 }
 0x3c8   : > { %v976_v26 = vsel %vm972_vm7, %v907_v7, %v943_v22  ;;  %v988_v63 = vsel %vm985_vm8, %v975_v21, %v3421_v58 }
 0x3c9   : > { %v989_v27 = vsel %vm985_vm8, %v976_v26, %v3469_v16  ;;  %v1012_v6 = vmul.f32 %v988_v63, %v3522_v28  ;;  %v1003_v26 = vmul.f32 %v3512_v24, %v3465_v15 }
 0x3ca   : > { %v945_v29 = vpop.permute.xlu0 %944  ;;  %v1013_v33 = vmul.f32 %v989_v27, %v3576_v51 }
 0x3cb   : > { %v977_v34 = vsel %vm972_vm7, %v909_v9, %v945_v29  ;;  %v1024_v49 = vadd.f32 %v1012_v6, %v1000_v46 }
 0x3cc   : > { %v990_v31 = vsel %vm985_vm8, %v977_v34, %v3461_v14  ;;  %v1025_v42 = vadd.f32 %v1013_v33, %v1001_v40 }
 0x3cd   : > { %v1014_v41 = vmul.f32 %v990_v31, %v3593_v3  ;;  %v1275_v48 = vpack.c.bf16 %v1024_v49, %v1024_v49  ;;  %v1196_v31 = vmul.f32 %v3662_v60, %v3431_v4 }
 0x3cf   : > { %v1026_v43 = vadd.f32 %v1014_v41, %v1002_v37  ;;  %v1197_v37 = vmul.f32 %v3664_v2, %v3445_v13 }
 0x3d1   : > { %v1276_v45 = vpack.c.bf16 %v1026_v43, %v1025_v42 }
 0x3d3   : > { %2905 = vmatprep.mubr.msk.bf16.mxu0 %vm1299_vm9, %v1276_v45 }
 0x40d   : > { %v1296_v0 = vpop.permute.xlu1 %1295 }
 0x40e   : > { %v1307_v47 = vsel %vm1299_vm9, %v1296_v0, 0  ;;  %3010 = vmatprep.subr.msk.bf16.mxu1 %vm1299_vm9, %v1296_v0 }
 0x40f   : > { %2896 = vmatpush3.bf16.xpose.msra.mxu1 %v1307_v47 }
 0x411   : > { %v1363_v50 = vpop.permute.xlu0 %1362  ;;  %v911_v52 = vpop.permute.xlu1 %910 }
 0x412   : > { %v1373_v27 = vsel %vm1299_vm9, %v1363_v50, 0 }
 0x415   : > { %v1365_v54 = vpop.permute.xlu0 %1364 }
 0x416   : > { %2898 = vmatmul.mubr.msk.bf16.vlgmr.msra.gmra.mxu1 %vm1299_vm9, %v1275_v48  ;;  %3011 = vmatprep.subr.msk.bf16.mxu0 %vm1299_vm9, %v1365_v54  ;;  %v1376_v55 = vsel %vm1299_vm9, %v1365_v54, 0  ;;  %v1007_v54 = vmul.f32 %v3565_v39, %v3479_v17 }
 0x417   : > { %2902 = vmatpush3.bf16.xpose.msra.mxu0 %v1376_v55 }
 0x418   : > { %3012 = vmatprep.subr.msk.bf16.mxu0 %vm1299_vm9, %v1363_v50 }
 0x419   : > { %v947_v7 = vpop.permute.xlu0 %946  ;;  %v1243_v5 = vpop.permute.xlu1 %1242 }
 0x41a   : > { %v978_v8 = vsel %vm972_vm7, %v911_v52, %v947_v7  ;;  %v1270_v9 = vadd.f32 %v1243_v5, %v1198_v1  ;;  %v1008_v52 = vmul.f32 %v3543_v35, %v3491_v20 }
 0x41b   : > { %v991_v10 = vsel %vm985_vm8, %v978_v8, %v3465_v15 }
 0x41c   : > { %v1015_v19 = vmul.f32 %v991_v10, %v3605_v11  ;;  %v1287_v21 = vpack.c.bf16 %v1270_v9, %v1270_v9  ;;  %v1009_v10 = vmul.f32 %v3512_v24, %v3485_v18 }
 0x41d   : > { %v1239_v22 = vpop.permute.xlu1 %1238 }
 0x41e   : > { %1430 = vrot.lane.b32.xlu0 %v1287_v21, %s3167_s25  ;;  %v1027_v44 = vadd.f32 %v1015_v19, %v1003_v26  ;;  %v1268_v41 = vadd.f32 %v1239_v22, %v1196_v31 }
 0x41f   : > { %2904 = vmatpush3.bf16.xpose.msra.mxu0 %v1373_v27 }
 0x420   : > { %v1277_v33 = vpack.c.bf16 %v1027_v44, %v1027_v44 }
 0x421   : > { %v919_v29 = vpop.permute.xlu1 %918 }
 0x422   : > { %914 = vrot.lane.b32.xlu0 %v3445_v13, %s3174_s26  ;;  %s4210_s26 = sld [smem:[#allocation8_spill]] (!%p2802_p5) }
 0x425   : > { %v955_v34 = vpop.permute.xlu1 %954 }
 0x426   : > { %2906 = vmatmul.mubr.msk.bf16.vlgmr.msra.gmra.mxu0 %vm1299_vm9, %v1277_v33  ;;  %950 = vrot.lane.b32.xlu0 %v3445_v13, %s3175_s16  ;;  %v982_v6 = vsel %vm972_vm7, %v919_v29, %v955_v34 }
 0x427   : > { %v995_v60 = vsel %vm985_vm8, %v982_v6, %v3479_v17 }
 0x428   : > { %v1241_v40 = vpop.permute.xlu0 %1240  ;;  %v1019_v49 = vmul.f32 %v995_v60, %v3576_v51 }
 0x429   : > { %v1269_v42 = vadd.f32 %v1241_v40, %v1197_v37  ;;  %v923_v45 = vpop.permute.xlu1 %922  ;;  %v1005_v37 = vmul.f32 %v3533_v30, %v3445_v13  ;;  %v1004_v40 = vmul.f32 %v3551_v36, %v3431_v4  ;;  %v1006_v30 = vmul.f32 %v3528_v32, %v3438_v12  ;;  %v1292_v32 = vld [vmem:[%s4182_s2 + $0x10] sm:$0x1f] }
 0x42a   : > { %952 = vrot.lane.b32.xlu0 %v3438_v12, %s3175_s16  ;;  %v1031_v7 = vadd.f32 %v1019_v49, %v1007_v54 }
 0x42b   : > { %v1286_v43 = vpack.c.bf16 %v1269_v42, %v1268_v41 }
 0x42c   : > { %v921_v63 = vpop.permute.xlu0 %920 }
 0x42d   : > { %1428 = vrot.lane.b32.xlu1 %v1286_v43, %s3167_s25  ;;  %v1495_v2 = vpop.permute.xlu1 %1494 }
 0x42e   : > { %v1505_v5 = vsel %vm1299_vm9, %v1495_v2, 0 }
 0x430   : > { %v1497_v0 = vpop.permute.xlu0 %1496 }
 0x431   : > { %v1508_v46 = vsel %vm1299_vm9, %v1497_v0, 0  ;;  %3015 = vmatprep.subr.msk.bf16.mxu0 %vm1299_vm9, %v1497_v0  ;;  %v913_v21 = vpop.permute.xlu1 %912 }
 0x432   : > { %2918 = vmatpush3.bf16.xpose.msra.mxu0 %v1508_v46 }
 0x433   : > { %3016 = vmatprep.subr.msk.bf16.mxu0 %vm1299_vm9, %v1495_v2 }
 0x434   : > { %v957_v47 = vpop.permute.xlu0 %956 }
 0x435   : > { %v983_v50 = vsel %vm972_vm7, %v921_v63, %v957_v47  ;;  %v949_v22 = vpop.permute.xlu1 %948 }
 0x436   : > { %v996_v48 = vsel %vm985_vm8, %v983_v50, %v3491_v20  ;;  %v979_v44 = vsel %vm972_vm7, %v913_v21, %v949_v22 }
 0x437   : > { %v1020_v55 = vmul.f32 %v996_v48, %v3593_v3 }
 0x438   : > { %v959_v1 = vpop.permute.xlu0 %958 }
 0x439   : > { %v1032_v8 = vadd.f32 %v1020_v55, %v1008_v52  ;;  %v984_v51 = vsel %vm972_vm7, %v923_v45, %v959_v1  ;;  %v917_v41 = vpop.permute.xlu1 %916  ;;  %v1291_v52 = vld [vmem:[%s4182_s2 + $0x8] sm:$0xff] }
 0x43a   : > { %v997_v9 = vsel %vm985_vm8, %v984_v51, %v3485_v18  ;;  %2920 = vmatpush3.bf16.xpose.msra.mxu0 %v1505_v5 }
 0x43b   : > { %v1021_v35 = vmul.f32 %v997_v9, %v3605_v11  ;;  %v1280_v19 = vpack.c.bf16 %v1032_v8, %v1031_v7  ;;  %v992_v11 = vsel %vm985_vm8, %v979_v44, %v3431_v4 }
 0x43c   : > { %v1016_v33 = vmul.f32 %v992_v11, %v3559_v38 }
 0x43d   : > { %v1033_v39 = vadd.f32 %v1021_v35, %v1009_v10  ;;  %2921 = vmatprep.mubr.msk.bf16.mxu0 %vm1299_vm9, %v1280_v19 }
 0x43e   : > { %v1028_v45 = vadd.f32 %v1016_v33, %v1004_v40 }
 0x43f   : > { %v1281_v3 = vpack.c.bf16 %v1033_v39, %v1033_v39 }
 0x441   : > { %2922 = vmatmul.mubr.msk.bf16.vlgmr.msra.gmra.mxu0 %vm1299_vm9, %v1281_v3 }
 0x490   : > { %v1431_v26 = vpop.permute.xlu0 %1430 }
 0x491   : > { %v1442_v27 = vsel %vm1299_vm9, %v1431_v26, 0  ;;  %3013 = vmatprep.subr.msk.bf16.mxu1 %vm1299_vm9, %v1431_v26 }
 0x492   : > { %2910 = vmatpush3.bf16.xpose.msra.mxu1 %v1442_v27 }
 0x494   : > { %v915_v24 = vpop.permute.xlu0 %914 }
 0x498   : > { %v951_v29 = vpop.permute.xlu0 %950 }
 0x499   : > { %v980_v34 = vsel %vm972_vm7, %v915_v24, %v951_v29 }
 0x49a   : > { %v993_v31 = vsel %vm985_vm8, %v980_v34, %v3445_v13 }
 0x49b   : > { %v1017_v42 = vmul.f32 %v993_v31, %v3584_v61 }
 0x49c   : > { %v953_v43 = vpop.permute.xlu0 %952 }
 0x49d   : > { %v1029_v63 = vadd.f32 %v1017_v42, %v1005_v37  ;;  %v981_v6 = vsel %vm972_vm7, %v917_v41, %v953_v43 }
 0x49e   : > { %v994_v38 = vsel %vm985_vm8, %v981_v6, %v3438_v12 }
 0x49f   : > { %v1018_v0 = vmul.f32 %v994_v38, %v3522_v28  ;;  %v1429_v46 = vpop.permute.xlu1 %1428  ;;  %v1278_v60 = vpack.c.bf16 %v1029_v63, %v1028_v45  ;;  %v1290_v28 = vld [vmem:[%s4182_s2] sm:$0xff] }
 0x4a0   : > { %v1439_v36 = vsel %vm1299_vm9, %v1429_v46, 0  ;;  %3014 = vmatprep.subr.msk.bf16.mxu1 %vm1299_vm9, %v1429_v46 }
 0x4a1   : > { %2912 = vmatpush3.bf16.xpose.msra.mxu1 %v1439_v36  ;;  %2913 = vmatprep.mubr.msk.bf16.mxu1 %vm1299_vm9, %v1278_v60  ;;  %v1030_v61 = vadd.f32 %v1018_v0, %v1006_v30 }
 0x4a3   : > { %v1279_v2 = vpack.c.bf16 %v1030_v61, %v1030_v61  ;;  %v1701_v61 = vpack.c.bf16 %v3421_v58, %v3421_v58 }
 0x4a8   : > { %2914 = vmatmul.mubr.msk.bf16.vlgmr.msra.gmra.mxu1 %vm1299_vm9, %v1279_v2  ;;  %v1700_v2 = vpack.c.bf16 %v3417_v53, %v3425_v62 }
 0x4d6   : > { %v2899_v47 = vpop.f32.mrf.mxu1 }
 0x4d7   : > { %v3836_v54 = vadd.f32 %v2899_v47, %v1292_v32 }
 0x4d8   : > { %v1346_v49 = vpop.f32.mrf.mxu1 }
 0x4d9   : > { %v3831_v50 = vadd.f32 %v1346_v49, %v1290_v28  ;;  %v1566_v8 = vsel %vm1565_vm11, %v3836_v54, -inf  ;;  %v1702_v49 = vpack.c.bf16 %v3461_v14, %v3469_v16 }
 0x4da   : > { %v2900_v48 = vpop.f32.mrf.mxu1 }
 0x4db   : > { %v1559_v55 = vsel %vm1558_vm10, %v3831_v50, -inf }
 0x4dc   : > { %v1349_v1 = vpop.f32.mrf.mxu1  ;;  %1560 = vmax.xlane.f32.xlu0 %v1559_v55 }
 0x4dd   : > { %v3840_v7 = vadd.f32 %v1349_v1, %v1291_v52 }
 0x4df   : > { %v1562_v5 = vsel %vm1558_vm10, %v3840_v7, -inf }
 0x4e0   : > { %1563 = vmax.xlane.f32.xlu1 %v1562_v5  ;;  %1567 = vmax.xlane.f32.xlu0 %v1566_v8 }
 0x4e6   : > { %v2907_v51 = vpop.f32.mrf.mxu0 }
 0x4e7   : > { %v3846_v9 = vadd.f32 %v2907_v51, %v1292_v32 }
 0x4e8   : > { %v1412_v10 = vpop.f32.mrf.mxu0 }
 0x4e9   : > { %v3848_v35 = vadd.f32 %v1412_v10, %v1290_v28  ;;  %v1575_v19 = vsel %vm1565_vm11, %v3846_v9, -inf }
 0x4ea   : > { %v2908_v39 = vpop.f32.mrf.mxu0  ;;  %1576 = vmax.xlane.f32.xlu1 %v1575_v19 }
 0x4eb   : > { %v1569_v3 = vsel %vm1558_vm10, %v3848_v35, -inf }
 0x4ec   : > { %v1415_v21 = vpop.f32.mrf.mxu0  ;;  %1570 = vmax.xlane.f32.xlu0 %v1569_v3 }
 0x4ed   : > { %v1416_v22 = vadd.f32 %v1415_v21, %v1291_v52 }
 0x4ef   : > { %v1572_v26 = vsel %vm1558_vm10, %v1416_v22, -inf }
 0x4f0   : > { %1573 = vmax.xlane.f32.xlu0 %v1572_v26 }
 0x501   : > { %v2923_v27 = vpop.f32.mrf.mxu0 }
 0x502   : > { %v1553_v29 = vadd.f32 %v2923_v27, %v1292_v32 }
 0x503   : > { %v1544_v44 = vpop.f32.mrf.mxu0 }
 0x504   : > { %v1545_v24 = vadd.f32 %v1544_v44, %v1290_v28  ;;  %v1593_v34 = vsel %vm1565_vm11, %v1553_v29, -inf }
 0x505   : > { %v2924_v11 = vpop.f32.mrf.mxu0 }
 0x506   : > { %v1587_v33 = vsel %vm1558_vm10, %v1545_v24, -inf }
 0x507   : > { %1588 = vmax.xlane.f32.xlu0 %v1587_v33  ;;  %v1547_v37 = vpop.f32.mrf.mxu0 }
 0x508   : > { %v3859_v43 = vadd.f32 %v1547_v37, %v1291_v52 }
 0x50a   : > { %v1590_v0 = vsel %vm1558_vm10, %v3859_v43, -inf }
 0x50b   : > { %1594 = vmax.xlane.f32.xlu0 %v1593_v34 }
 0x565   : > { %v1561_v30 = vpop.xlane.xlu0 %1560 }
 0x566   : > { %v1596_v62 = vsub.f32 %v3831_v50, %v1561_v30 }
 0x568   : > { %v2915_v31 = vpop.f32.mrf.mxu1 }
 0x569   : > { %v3865_v38 = vadd.f32 %v2915_v31, %v1292_v32  ;;  %v1568_v36 = vpop.xlane.xlu0 %1567  ;;  %v1564_v55 = vpop.xlane.xlu1 %1563 }
 0x56a   : > { %v1478_v40 = vpop.f32.mrf.mxu1  ;;  %v1598_v58 = vsub.f32 %v3836_v54, %v1568_v36 }
 0x56b   : > { %v3857_v41 = vadd.f32 %v1478_v40, %v1290_v28  ;;  %v1584_v60 = vsel %vm1565_vm11, %v3865_v38, -inf  ;;  %v1703_v28 = vpack.c.bf16 %v3465_v15, %v3465_v15  ;;  %v1597_v15 = vsub.f32 %v3840_v7, %v1564_v55 }
 0x56c   : > { %v2916_v42 = vpop.f32.mrf.mxu1  ;;  %v1612_v48 = vmul.f32 1.442695, %v1598_v58 }
 0x56d   : > { %v1578_v45 = vsel %vm1558_vm10, %v3857_v41, -inf  ;;  %v1610_v14 = vmul.f32 1.442695, %v1597_v15  ;;  %v1705_v15 = vpack.c.bf16 %v3438_v12, %v3438_v12 }
 0x56e   : > { %v1481_v63 = vpop.f32.mrf.mxu1  ;;  %1579 = vmax.xlane.f32.xlu1 %v1578_v45  ;;  %3069 = vpow2.f32 %v1612_v48  ;;  %v1706_v45 = vpack.c.bf16 %v3491_v20, %v3479_v17 }
 0x56f   : > { %v3863_v6 = vadd.f32 %v1481_v63, %v1291_v52  ;;  %v1608_v52 = vmul.f32 1.442695, %v1596_v62 }
 0x571   : > { %v1581_v46 = vsel %vm1558_vm10, %v3863_v6, -inf  ;;  %3071 = vpow2.f32 %v1608_v52 }
 0x572   : > { %1591 = vmax.xlane.f32.xlu1 %v1590_v0  ;;  %1582 = vmax.xlane.f32.xlu0 %v1581_v46 }
 0x573   : > { %v1577_v8 = vpop.xlane.xlu1 %1576 }
 0x574   : > { %v1601_v16 = vsub.f32 %v3846_v9, %v1577_v8 }
 0x575   : > { %v1571_v47 = vpop.xlane.xlu0 %1570 }
 0x576   : > { %1585 = vmax.xlane.f32.xlu1 %v1584_v60  ;;  %v1618_v50 = vmul.f32 1.442695, %v1601_v16  ;;  %v1599_v39 = vsub.f32 %v3848_v35, %v1571_v47 }
 0x578   : > { %v1614_v7 = vmul.f32 1.442695, %v1599_v39 }
 0x579   : > { %v1574_v32 = vpop.xlane.xlu0 %1573 }
 0x57a   : > { %v1600_v1 = vsub.f32 %v1416_v22, %v1574_v32 }
 0x57b   : > { %v3890_v21 = vpop.eup %3069 }
 0x57c   : > { %v1616_v51 = vmul.f32 1.442695, %v1600_v1  ;;  %v1638_v22 = vsel %vm1565_vm11, %v3890_v21, 0.0 }
 0x57e   : > { %3073 = vpow2.f32 %v1616_v51  ;;  %v3894_v26 = vpop.eup %3071 }
 0x57f   : > { %3075 = vpow2.f32 %v1610_v14  ;;  %v1632_v9 = vsel %vm1558_vm10, %v3894_v26, 0.0 }
 0x587   : > { %1712 = vrot.lane.b32.xlu1 %v1701_v61, %s3176_s30 }
 0x588   : > { %1710 = vrot.lane.b32.xlu0 %v1700_v2, %s3176_s30  ;;  %v3177_v2 = vmov 65535  }
 0x589   : > { %v1722_v47 = vsel %vm1721_vm12, 4294967295, %v3177_v2 }
 0x58a   : > { %v3929_v17 = vsel %vm868_vm6, %v1722_v47, 0 }
 0x58b   : > { %1779 = vrot.lane.b32.xlu1 %v1703_v28, %s3176_s30  ;;  %v3898_v27 = vpop.eup %3073 }
 0x58c   : > { %v3900_v35 = vpop.eup %3075  ;;  %v1644_v44 = vsel %vm1558_vm10, %v3898_v27, 0.0 }
 0x58f   : > { %1777 = vrot.lane.b32.xlu1 %v1702_v49, %s3176_s30 }
 0x590   : > { %v1589_v53 = vpop.xlane.xlu0 %1588 }
 0x591   : > { %v1605_v54 = vsub.f32 %v1545_v24, %v1589_v53 }
 0x593   : > { %v1626_v3 = vmul.f32 1.442695, %v1605_v54 }
 0x594   : > { %v1595_v5 = vpop.xlane.xlu0 %1594 }
 0x595   : > { %v1607_v10 = vsub.f32 %v1553_v29, %v1595_v5  ;;  %v1635_v29 = vsel %vm1558_vm10, %v3900_v35, 0.0  ;;  %v1707_v5 = vpack.c.bf16 %v3485_v18, %v3485_v18 }
 0x597   : > { %v1630_v19 = vmul.f32 1.442695, %v1607_v10 }
 0x599   : > { %3077 = vpow2.f32 %v1630_v19 }
 0x59a   : > { %3079 = vpow2.f32 %v1618_v50 }
 0x59b   : > { %3081 = vpow2.f32 %v1626_v3 }
 0x59c   : > { %3083 = vpow2.f32 %v1614_v7 }
 0x5a6   : > { %v3904_v24 = vpop.eup %3077 }
 0x5a7   : > { %1639 = vadd.xlane.f32.xlu0 %v1638_v22  ;;  %v3906_v11 = vpop.eup %3079  ;;  %v1665_v33 = vsel %vm1565_vm11, %v3904_v24, 0.0 }
 0x5a8   : > { %v3912_v34 = vpop.eup %3081  ;;  %v1647_v31 = vsel %vm1565_vm11, %v3906_v11, 0.0 }
 0x5a9   : > { %v1659_v37 = vsel %vm1558_vm10, %v3912_v34, 0.0  ;;  %v3918_v40 = vpop.eup %3083 }
 0x5aa   : > { %v1641_v42 = vsel %vm1558_vm10, %v3918_v40, 0.0 }
 0x5ab   : > { %1633 = vadd.xlane.f32.xlu0 %v1632_v9 }
 0x5af   : > { %1645 = vadd.xlane.f32.xlu0 %v1644_v44 }
 0x5b3   : > { %1636 = vadd.xlane.f32.xlu1 %v1635_v29  ;;  %1666 = vadd.xlane.f32.xlu0 %v1665_v33 }
 0x5b7   : > { %1648 = vadd.xlane.f32.xlu1 %v1647_v31  ;;  %1660 = vadd.xlane.f32.xlu0 %v1659_v37 }
 0x5bb   : > { %1642 = vadd.xlane.f32.xlu1 %v1641_v42 }
 0x5cd   : > { %1905 = vrot.lane.b32.xlu0 %v1706_v45, %s3176_s30 }
 0x5f7   : > { %v1580_v63 = vpop.xlane.xlu1 %1579 }
 0x5f8   : > { %v1602_v8 = vsub.f32 %v3857_v41, %v1580_v63 }
 0x5fa   : > { %v1620_v51 = vmul.f32 1.442695, %v1602_v8 }
 0x5fb   : > { %v1592_v0 = vpop.xlane.xlu1 %1591  ;;  %v1583_v46 = vpop.xlane.xlu0 %1582 }
 0x5fc   : > { %v1606_v60 = vsub.f32 %v3859_v43, %v1592_v0  ;;  %v1603_v30 = vsub.f32 %v3863_v6, %v1583_v46 }
 0x5fe   : > { %v1628_v36 = vmul.f32 1.442695, %v1606_v60  ;;  %v1622_v61 = vmul.f32 1.442695, %v1603_v30 }
 0x5ff   : > { %v1586_v28 = vpop.xlane.xlu1 %1585  ;;  %v1711_v43 = vpop.permute.xlu0 %1710 }
 0x600   : > { %3085 = vpow2.f32 %v1628_v36  ;;  %v1604_v32 = vsub.f32 %v3865_v38, %v1586_v28 }
 0x601   : > { %3087 = vpow2.f32 %v1622_v61 }
 0x602   : > { %v1624_v20 = vmul.f32 1.442695, %v1604_v32 }
 0x603   : > { %v1713_v49 = vpop.permute.xlu1 %1712 }
 0x604   : > { %3089 = vpow2.f32 %v1624_v20  ;;  %v1725_v58 = vand.u32 %v3929_v17, %v1713_v49 }
 0x605   : > { %3091 = vpow2.f32 %v1620_v51 }
 0x606   : > { %2925 = vmatprep.subr.bf16.mxu1 %v1725_v58 }
 0x607   : > { %2926 = vmatpush3.bf16.msra.mxu1 %v1725_v58  ;;  %v1780_v6 = vpop.permute.xlu1 %1779 }
 0x608   : > { %2927 = vmatprep.subr.bf16.mxu1 %v1711_v43  ;;  %v1789_v53 = vand.u32 %v1780_v6, %v3929_v17 }
 0x60b   : > { %2928 = vmatpush3.bf16.msra.mxu1 %v1711_v43  ;;  %v1778_v14 = vpop.permute.xlu1 %1777 }
 0x60c   : > { %2933 = vmatprep.subr.bf16.mxu1 %v1789_v53 }
 0x60d   : > { %v3933_v62 = vpop.eup %3085 }
 0x60e   : > { %v3935_v38 = vpop.eup %3087  ;;  %v1662_v48 = vsel %vm1558_vm10, %v3933_v62, 0.0 }
 0x60f   : > { %1663 = vadd.xlane.f32.xlu1 %v1662_v48  ;;  %v1653_v52 = vsel %vm1558_vm10, %v3935_v38, 0.0 }
 0x610   : > { %1654 = vadd.xlane.f32.xlu0 %v1653_v52 }
 0x611   : > { %v3941_v55 = vpop.eup %3089 }
 0x612   : > { %v1656_v1 = vsel %vm1565_vm11, %v3941_v55, 0.0  ;;  %v3952_v19 = vpop.eup %3091 }
 0x613   : > { %v1650_v12 = vsel %vm1558_vm10, %v3952_v19, 0.0 }
 0x614   : > { %1657 = vadd.xlane.f32.xlu0 %v1656_v1 }
 0x620   : > { %1907 = vrot.lane.b32.xlu1 %v1707_v5, %s3176_s30 }
 0x62a   : > { %1843 = vrot.lane.b32.xlu0 %v1705_v15, %s3176_s30  ;;  %v3049_v15 = vld [vmem:[%s3292_s15 + $0x8] sm:$0xff]  }
 0x630   : > { %v1640_v10 = vpop.xlane.xlu0 %1639 }
 0x631   : > { %3093 = vrcp.f32 %v1640_v10  ;;  %v3050_v10 = vld [vmem:[%s3292_s15] sm:$0xff]  }
 0x634   : > { %v1634_v16 = vpop.xlane.xlu0 %1633 }
 0x635   : > { %3095 = vrcp.f32 %v1634_v16 }
 0x638   : > { %v1646_v18 = vpop.xlane.xlu0 %1645 }
 0x63c   : > { %v1637_v54 = vpop.xlane.xlu1 %1636  ;;  %v1667_v46 = vpop.xlane.xlu0 %1666 }
 0x63d   : > { %3097 = vrcp.f32 %v1637_v54 }
 0x63e   : > { %v3094_v39 = vpop.eup %3093 }
 0x63f   : > { %v1682_v22 = vmul.f32 %v3094_v39, %v3890_v21  ;;  %v1704_v21 = vpack.c.bf16 %v3445_v13, %v3431_v4 }
 0x640   : > { %v1649_v50 = vpop.xlane.xlu1 %1648  ;;  %v1661_v60 = vpop.xlane.xlu0 %1660 }
 0x641   : > { %3099 = vrcp.f32 %v1649_v50  ;;  %v1693_v33 = vpack.c.bf16 %v1682_v22, %v1682_v22 }
 0x642   : > { %3101 = vrcp.f32 %v1646_v18  ;;  %v3096_v3 = vpop.eup %3095 }
 0x643   : > { %v1680_v9 = vmul.f32 %v3096_v3, %v3894_v26 }
 0x644   : > { %1651 = vadd.xlane.f32.xlu1 %v1650_v12  ;;  %v1643_v41 = vpop.xlane.xlu1 %1642  ;;  %v1906_v30 = vpop.permute.xlu0 %1905 }
 0x645   : > { %3103 = vrcp.f32 %v1643_v41 }
 0x646   : > { %3105 = vrcp.f32 %v1667_v46 }
 0x647   : > { %3107 = vrcp.f32 %v1661_v60 }
 0x64a   : > { %v3098_v7 = vpop.eup %3097 }
 0x64b   : > { %v1681_v44 = vmul.f32 %v3098_v7, %v3900_v35 }
 0x64d   : > { %v1692_v29 = vpack.c.bf16 %v1681_v44, %v1680_v9 }
 0x64e   : > { %v3100_v31 = vpop.eup %3099 }
 0x64f   : > { %2929 = vmatprep.mubr.msk.bf16.mxu1 %vm1558_vm10, %v1692_v29  ;;  %v3102_v37 = vpop.eup %3101  ;;  %v1685_v45 = vmul.f32 %v3100_v31, %v3906_v11 }
 0x650   : > { %2930 = vmatmul.mubr.msk.bf16.vlgmr.msra.gmra.mxu1 %vm1558_vm10, %v1693_v33  ;;  %v1684_v35 = vmul.f32 %v3102_v37, %v3898_v27 }
 0x651   : > { %2934 = vmatpush3.bf16.msra.mxu1 %v1789_v53  ;;  %v1695_v0 = vpack.c.bf16 %v1685_v45, %v1685_v45 }
 0x652   : > { %v3104_v42 = vpop.eup %3103  ;;  %2935 = vmatprep.subr.bf16.mxu1 %v1778_v14 }
 0x653   : > { %v1683_v26 = vmul.f32 %v3104_v42, %v3918_v40  ;;  %v3106_v2 = vpop.eup %3105 }
 0x654   : > { %v3108_v47 = vpop.eup %3107  ;;  %v1691_v32 = vmul.f32 %v3106_v2, %v3904_v24 }
 0x655   : > { %2936 = vmatpush3.bf16.msra.mxu1 %v1778_v14  ;;  %1841 = vrot.lane.b32.xlu1 %v1704_v21, %s3176_s30  ;;  %v1694_v63 = vpack.c.bf16 %v1684_v35, %v1683_v26  ;;  %v1689_v20 = vmul.f32 %v3108_v47, %v3912_v34 }
 0x656   : > { %v1699_v43 = vpack.c.bf16 %v1691_v32, %v1691_v32  ;;  %v2787_v32 = vld [vmem:[%s596_s23] ss:$0 sm:$0xff] }
 0x657   : > { %2937 = vmatprep.mubr.msk.bf16.mxu1 %vm1558_vm10, %v1694_v63 }
 0x658   : > { %2938 = vmatmul.mubr.msk.bf16.vlgmr.msra.gmra.mxu1 %vm1558_vm10, %v1695_v0 }
 0x698   : > { %v1664_v11 = vpop.xlane.xlu1 %1663 }
 0x699   : > { %3109 = vrcp.f32 %v1664_v11  ;;  %v1655_v4 = vpop.xlane.xlu0 %1654 }
 0x69c   : > { %v1908_v13 = vpop.permute.xlu1 %1907 }
 0x69d   : > { %v1917_v27 = vand.u32 %v1908_v13, %v3929_v17  ;;  %v1658_v40 = vpop.xlane.xlu0 %1657 }
 0x69e   : > { %3111 = vrcp.f32 %v1658_v40 }
 0x69f   : > { %2949 = vmatprep.subr.bf16.mxu1 %v1917_v27  ;;  %3113 = vrcp.f32 %v1655_v4 }
 0x6a0   : > { %2950 = vmatpush3.bf16.msra.mxu1 %v1917_v27 }
 0x6a1   : > { %v1844_v36 = vpop.permute.xlu0 %1843  ;;  %2951 = vmatprep.subr.bf16.mxu1 %v1906_v30 }
 0x6a2   : > { %v1853_v61 = vand.u32 %v1844_v36, %v3929_v17 }
 0x6a4   : > { %2941 = vmatprep.subr.bf16.mxu0 %v1853_v61  ;;  %2952 = vmatpush3.bf16.msra.mxu1 %v1906_v30 }
 0x6a5   : > { %2942 = vmatpush3.bf16.msra.mxu0 %v1853_v61  ;;  %2973 = vmatprep.subr.bf16.mxu1 %v3168_v59 }
 0x6a6   : > { %v3110_v28 = vpop.eup %3109 }
 0x6a7   : > { %v1690_v49 = vmul.f32 %v3110_v28, %v3933_v62 }
 0x6a9   : > { %v1698_v58 = vpack.c.bf16 %v1690_v49, %v1689_v20  ;;  %v3141_v20 = vld [vmem:[#allocation2] sm:$0xff] }
 0x6ab   : > { %2953 = vmatprep.mubr.msk.bf16.mxu1 %vm1558_vm10, %v1698_v58  ;;  %v3112_v24 = vpop.eup %3111 }
 0x6ac   : > { %2954 = vmatmul.mubr.msk.bf16.vlgmr.msra.gmra.mxu1 %vm1558_vm10, %v1699_v43  ;;  %v3114_v34 = vpop.eup %3113  ;;  %v1688_v62 = vmul.f32 %v3112_v24, %v3941_v55 }
 0x6ad   : > { %2977 = vmatprep.mubr.msk.bf16.mxu1 %vm3169_vm4, %v3168_v59  ;;  %v1687_v52 = vmul.f32 %v3114_v34, %v3935_v38 }
 0x6ae   : > { %v1697_v5 = vpack.c.bf16 %v1688_v62, %v1688_v62 }
 0x6cd   : > { %v1652_v17 = vpop.xlane.xlu1 %1651 }
 0x6ce   : > { %3115 = vrcp.f32 %v1652_v17 }
 0x6d1   : > { %v1842_v6 = vpop.permute.xlu1 %1841 }
 0x6d2   : > { %2943 = vmatprep.subr.bf16.mxu0 %v1842_v6 }
 0x6d3   : > { %2944 = vmatpush3.bf16.msra.mxu0 %v1842_v6  ;;  %v3142_v6 = vld [vmem:[#allocation2 + $0x8] sm:$0xff] }
 0x6d4   : > { %2957 = vmatprep.subr.bf16.mxu0 %v3168_v59 }
 0x6db   : > { %v3116_v53 = vpop.eup %3115 }
 0x6dc   : > { %v1686_v48 = vmul.f32 %v3116_v53, %v3952_v19 }
 0x6de   : > { %v1696_v1 = vpack.c.bf16 %v1687_v52, %v1686_v48 }
 0x6e0   : > { %2945 = vmatprep.mubr.msk.bf16.mxu0 %vm1558_vm10, %v1696_v1  ;;  %v3143_v1 = vld [vmem:[#allocation2 + $0x10] sm:$0xff] }
 0x6e1   : > { %2946 = vmatmul.mubr.msk.bf16.vlgmr.msra.gmra.mxu0 %vm1558_vm10, %v1697_v5 }
 0x6e2   : > { %2961 = vmatprep.mubr.msk.bf16.mxu0 %vm3169_vm4, %v3168_v59  ;;  %2958 = vmatpush3.bf16.msra.mxu0 %v3049_v15 }
 0x6e3   : > { %2959 = vmatprep.subr.bf16.mxu0 %v3168_v59 }
 0x6e6   : > { %2960 = vmatpush3.bf16.msra.mxu0 %v3050_v10 }
 0x6e7   : > { %2989 = vmatprep.subr.bf16.mxu0 %v3168_v59 }
 0x710   : > { %v2931_v8 = vpop.f32.mrf.mxu1 }
 0x712   : > { %v1761_v51 = vpop.f32.mrf.mxu1 }
 0x714   : > { %v2932_v55 = vpop.f32.mrf.mxu1 }
 0x715   : > { %v3144_v55 = vld [vmem:[#allocation2 + $0x18] sm:$0xff] }
 0x716   : > { %v1764_v14 = vpop.f32.mrf.mxu1 }
 0x718   : > { %v2939_v38 = vpop.f32.mrf.mxu1 }
 0x719   : > { %1974 = vrot.lane.b32.xlu0 %v2939_v38, %s3178_s17 }
 0x71a   : > { %v1825_v16 = vpop.f32.mrf.mxu1 }
 0x71c   : > { %v2940_v54 = vpop.f32.mrf.mxu1 }
 0x71e   : > { %v1828_v19 = vpop.f32.mrf.mxu1 }
 0x71f   : > { %v3037_v18 = vpack.i.bf16 %v1828_v19, %v1825_v16  ;;  %v3145_v19 = vld [vmem:[#allocation2 + $0x20] sm:$0xff] }
 0x721   : > { %3038 = vrot.lane.b32.xlu1 %v3037_v18, %s3178_s17 }
 0x76c   : > { %v2955_v50 = vpop.f32.mrf.mxu1 }
 0x76e   : > { %v1953_v12 = vpop.f32.mrf.mxu1 }
 0x770   : > { %v2956_v41 = vpop.f32.mrf.mxu1 }
 0x772   : > { %v1956_v39 = vpop.f32.mrf.mxu1 }
 0x773   : > { %v3042_v3 = vpack.i.bf16 %v1956_v39, %v1953_v12 }
 0x775   : > { %3043 = vrot.lane.b32.xlu1 %v3042_v3, %s3178_s17  ;;  %v3146_v3 = vld [vmem:[#allocation2 + $0x28] sm:$0x3] }
 0x779   : > { %1989 = vrot.lane.b32.xlu1 %v2955_v50, %s3178_s17 }
 0x78b   : > { %v1975_v35 = vpop.permute.xlu0 %1974 }
 0x78c   : > { %v1981_v4 = vsel %vm1299_vm9, %v2931_v8, %v1975_v35 }
 0x793   : > { %v3039_v7 = vpop.permute.xlu1 %3038 }
 0x794   : > { %v3041_v22 = vunpack.i.h.bf16 %v3039_v7  ;;  %v3040_v9 = vunpack.i.l.bf16 %v3039_v7 }
 0x796   : > { %v1980_v44 = vsel %vm1299_vm9, %v1764_v14, %v3041_v22  ;;  %v1979_v29 = vsel %vm1299_vm9, %v1761_v51, %v3040_v9 }
 0x797   : > { %v2010_v33 = vpack.c.bf16 %v1980_v44, %v1979_v29 }
 0x799   : > { %2962 = vmatmul.mubr.msk.bf16.vlgmr.msra.gmra.mxu0 %vm639_vm2, %v2010_v33 }
 0x79a   : > { %2965 = vmatprep.mubr.msk.bf16.mxu0 %vm3169_vm4, %v3168_v59 }
 0x7a1   : > { %v2947_v31 = vpop.f32.mrf.mxu0 }
 0x7a3   : > { %v1889_v37 = vpop.f32.mrf.mxu0 }
 0x7a5   : > { %v2948_v42 = vpop.f32.mrf.mxu0 }
 0x7a7   : > { %v1892_v63 = vpop.f32.mrf.mxu0 }
 0x7e7   : > { %v3044_v45 = vpop.permute.xlu1 %3043 }
 0x7e8   : > { %v3046_v21 = vunpack.i.h.bf16 %v3044_v45  ;;  %v3045_v26 = vunpack.i.l.bf16 %v3044_v45 }
 0x7ea   : > { %v1994_v0 = vsel %vm1299_vm9, %v1889_v37, %v3045_v26  ;;  %v1995_v46 = vsel %vm1299_vm9, %v1892_v63, %v3046_v21 }
 0x7eb   : > { %v2000_v60 = vrot.slane %v1994_v0, 3  ;;  %v2001_v30 = vrot.slane %v1995_v46, 3  ;;  %v1990_v11 = vpop.permute.xlu1 %1989 }
 0x7ec   : > { %v1996_v13 = vsel %vm1299_vm9, %v2947_v31, %v1990_v11 }
 0x7ed   : > { %v2002_v27 = vsel %vm759_vm5, %v2000_v60, %v2001_v30  ;;  %v2009_v40 = vsel %vm759_vm5, %v1981_v4, %v2000_v60  ;;  %v2003_v61 = vrot.slane %v1996_v13, 3 }
 0x7ee   : > { %v2011_v36 = vpack.c.bf16 %v2002_v27, %v2009_v40 }
 0x7ef   : > { %v2004_v2 = vsel %vm759_vm5, %v2001_v30, %v2003_v61 }
 0x7f0   : > { %2966 = vmatmul.mubr.msk.bf16.gmra.mxu0 %vm639_vm2, %v2011_v36  ;;  %v2012_v47 = vpack.c.bf16 %v2003_v61, %v2004_v2 }
 0x7f1   : > { %2969 = vmatprep.mubr.msk.bf16.mxu0 %vm3169_vm4, %v3168_v59 }
 0x7f8   : > { %2970 = vmatmul.mubr.msk.bf16.gmra.mxu0 %vm639_vm2, %v2012_v47 }
 0x7f9   : > { %2997 = vmatprep.mubr.msk.bf16.mxu0 %vm3169_vm4, %v3168_v59 }
 0x859   : > { %v2072_v28 = vpop.f32.mrf.mxu0 }
 0x85a   : > { %v2095_v49 = vadd.f32 %v3141_v20, %v2072_v28 }
 0x85b   : > { %v2963_v58 = vpop.f32.mrf.mxu0 }
 0x85c   : > { %v4014_v43 = vadd.f32 %v2787_v32, %v2095_v49  ;;  %v3051_v49 = vld [vmem:[%s3301_s1 + $0x8] sm:$0xff]   ;;  %v3052_v58 = vld [vmem:[%s3301_s1] sm:$0xff]  }
 0x85d   : > { %v2075_v17 = vpop.f32.mrf.mxu0  ;;  %2974 = vmatpush3.bf16.msra.mxu1 %v3051_v49 }
 0x85e   : > { %v2096_v24 = vadd.f32 %v3142_v6, %v2075_v17  ;;  %v2114_v34 = vsel %vm639_vm2, %v4014_v43, 0.0  ;;  %2975 = vmatprep.subr.bf16.mxu1 %v3168_v59 }
 0x85f   : > { %2115 = vadd.xlane.f32.xlu0 %v2114_v34  ;;  %v2964_v53 = vpop.f32.mrf.mxu0 }
 0x860   : > { %v4018_v62 = vadd.f32 %v2787_v32, %v2096_v24 }
 0x861   : > { %2976 = vmatpush3.bf16.msra.mxu1 %v3052_v58 }
 0x862   : > { %v2117_v48 = vsel %vm639_vm2, %v4018_v62, 0.0 }
 0x863   : > { %2118 = vadd.xlane.f32.xlu1 %v2117_v48 }
 0x8b0   : > { %v2080_v52 = vpop.f32.mrf.mxu0 }
 0x8b1   : > { %v2097_v5 = vadd.f32 %v3143_v1, %v2080_v52 }
 0x8b2   : > { %v2967_v15 = vpop.f32.mrf.mxu0 }
 0x8b3   : > { %v4022_v8 = vadd.f32 %v2787_v32, %v2097_v5 }
 0x8b4   : > { %v2083_v51 = vpop.f32.mrf.mxu0 }
 0x8b5   : > { %v2098_v10 = vadd.f32 %v3144_v55, %v2083_v51  ;;  %v2120_v14 = vsel %vm639_vm2, %v4022_v8, 0.0 }
 0x8b6   : > { %2121 = vadd.xlane.f32.xlu0 %v2120_v14  ;;  %v2968_v38 = vpop.f32.mrf.mxu0 }
 0x8b7   : > { %v4026_v16 = vadd.f32 %v2787_v32, %v2098_v10 }
 0x8b8   : > { %v2088_v54 = vpop.f32.mrf.mxu0 }
 0x8b9   : > { %v2099_v18 = vadd.f32 %v3145_v19, %v2088_v54  ;;  %v2123_v50 = vsel %vm639_vm2, %v4026_v16, 0.0 }
 0x8ba   : > { %2124 = vadd.xlane.f32.xlu0 %v2123_v50  ;;  %v2971_v12 = vpop.f32.mrf.mxu0 }
 0x8bb   : > { %v4030_v41 = vadd.f32 %v2787_v32, %v2099_v18 }
 0x8bc   : > { %v2091_v39 = vpop.f32.mrf.mxu0 }
 0x8bd   : > { %v2100_v7 = vadd.f32 %v3146_v3, %v2091_v39  ;;  %v2126_v22 = vsel %vm639_vm2, %v4030_v41, 0.0 }
 0x8be   : > { %2127 = vadd.xlane.f32.xlu0 %v2126_v22  ;;  %v2972_v9 = vpop.f32.mrf.mxu0 }
 0x8bf   : > { %v4034_v44 = vadd.f32 %v2787_v32, %v2100_v7 }
 0x8c1   : > { %v2129_v29 = vsel %vm655_vm3, %v4034_v44, 0.0 }
 0x8c2   : > { %2130 = vadd.xlane.f32.xlu1 %v2129_v29 }
 0x8e8   : > { %v2116_v33 = vpop.xlane.xlu0 %2115 }
 0x8e9   : > { %v2132_v31 = vmul.f32 0.03125, %v2116_v33 }
 0x8eb   : > { %v2138_v37 = vsub.f32 %v4014_v43, %v2132_v31 }
 0x8ec   : > { %v2119_v42 = vpop.xlane.xlu1 %2118 }
 0x8ed   : > { %v2133_v45 = vmul.f32 0.03125, %v2119_v42  ;;  %v2144_v21 = vmul.f32 %v2138_v37, %v2138_v37 }
 0x8ef   : > { %v2139_v26 = vsub.f32 %v4018_v62, %v2133_v45  ;;  %v2150_v35 = vsel %vm639_vm2, %v2144_v21, 0.0 }
 0x8f0   : > { %2151 = vadd.xlane.f32.xlu0 %v2150_v35 }
 0x8f1   : > { %v2145_v63 = vmul.f32 %v2139_v26, %v2139_v26 }
 0x8f3   : > { %v2153_v0 = vsel %vm639_vm2, %v2145_v63, 0.0 }
 0x8f4   : > { %2154 = vadd.xlane.f32.xlu1 %v2153_v0 }
 0x93f   : > { %v2122_v46 = vpop.xlane.xlu0 %2121 }
 0x940   : > { %v2134_v60 = vmul.f32 0.03125, %v2122_v46 }
 0x942   : > { %v4043_v30 = vsub.f32 %v4022_v8, %v2134_v60 }
 0x943   : > { %v2125_v11 = vpop.xlane.xlu0 %2124 }
 0x944   : > { %v2135_v4 = vmul.f32 0.03125, %v2125_v11  ;;  %v2146_v13 = vmul.f32 %v4043_v30, %v4043_v30 }
 0x946   : > { %v4048_v27 = vsub.f32 %v4026_v16, %v2135_v4  ;;  %v2156_v40 = vsel %vm639_vm2, %v2146_v13, 0.0 }
 0x947   : > { %2157 = vadd.xlane.f32.xlu0 %v2156_v40  ;;  %v2128_v36 = vpop.xlane.xlu0 %2127 }
 0x948   : > { %v2136_v61 = vmul.f32 0.03125, %v2128_v36  ;;  %v2147_v2 = vmul.f32 %v4048_v27, %v4048_v27 }
 0x94a   : > { %v4054_v47 = vsub.f32 %v4030_v41, %v2136_v61  ;;  %v2159_v28 = vsel %vm639_vm2, %v2147_v2, 0.0 }
 0x94b   : > { %2160 = vadd.xlane.f32.xlu1 %v2159_v28  ;;  %v2131_v17 = vpop.xlane.xlu1 %2130 }
 0x94c   : > { %v2148_v32 = vmul.f32 %v4054_v47, %v4054_v47  ;;  %v2137_v6 = vmul.f32 0.03125, %v2131_v17 }
 0x94e   : > { %v2162_v20 = vsel %vm639_vm2, %v2148_v32, 0.0  ;;  %v2143_v24 = vsub.f32 %v4034_v44, %v2137_v6  ;;  %v3053_v6 = vld [vmem:[%s3311_s18 + $0x18] sm:$0xff]  }
 0x94f   : > { %2163 = vadd.xlane.f32.xlu0 %v2162_v20  ;;  %2990 = vmatpush3.bf16.msra.mxu0 %v3053_v6 }
 0x950   : > { %v2149_v34 = vmul.f32 %v2143_v24, %v2143_v24  ;;  %2991 = vmatprep.subr.bf16.mxu0 %v3168_v59 }
 0x952   : > { %v2165_v53 = vsel %vm655_vm3, %v2149_v34, 0.0  ;;  %v3054_v34 = vld [vmem:[%s3311_s18 + $0x10] sm:$0xff]  }
 0x953   : > { %2992 = vmatpush3.bf16.msra.mxu0 %v3054_v34 }
 0x954   : > { %2993 = vmatprep.subr.bf16.mxu0 %v3168_v59 }
 0x95c   : > { %2199 = vrot.lane.b32.xlu1 %v3379_v57, %s3173_s29 }
 0x960   : > { %2206 = vrot.lane.b32.xlu1 %v3345_v25, %s3176_s30 }
 0x965   : > { %2193 = vrot.lane.b32.xlu0 %v3343_v23, %s3176_s30 }
 0x979   : > { %v2152_v57 = vpop.xlane.xlu0 %2151 }
 0x97a   : > { %v2168_v52 = vmul.f32 0.03125, %v2152_v57 }
 0x97c   : > { %v2174_v25 = vadd.f32 1e-05, %v2168_v52 }
 0x97d   : > { %v2155_v48 = vpop.xlane.xlu1 %2154 }
 0x97e   : > { %v2169_v1 = vmul.f32 0.03125, %v2155_v48  ;;  %3117 = vrsqrt.f32 %v2174_v25 }
 0x980   : > { %v2175_v5 = vadd.f32 1e-05, %v2169_v1 }
 0x982   : > { %3119 = vrsqrt.f32 %v2175_v5 }
 0x984   : > { %2166 = vadd.xlane.f32.xlu1 %v2165_v53  ;;  %v2788_v53 = vld [vmem:[%s604_s5] ss:$0 sm:$0xff] }
 0x98b   : > { %v3118_v15 = vpop.eup %3117 }
 0x98c   : > { %v2186_v14 = vmul.f32 %v3118_v15, %v2138_v37 }
 0x98f   : > { %v3120_v51 = vpop.eup %3119 }
 0x990   : > { %v2187_v38 = vmul.f32 %v3120_v51, %v2139_v26 }
 0x995   : > { %2213 = vrot.lane.b32.xlu1 %v3377_v56, %s3173_s29 }
 0x9d0   : > { %v2158_v23 = vpop.xlane.xlu0 %2157 }
 0x9d1   : > { %v2170_v3 = vmul.f32 0.03125, %v2158_v23 }
 0x9d3   : > { %v2176_v22 = vadd.f32 1e-05, %v2170_v3 }
 0x9d4   : > { %v2161_v55 = vpop.xlane.xlu1 %2160 }
 0x9d5   : > { %v2171_v7 = vmul.f32 0.03125, %v2161_v55  ;;  %3121 = vrsqrt.f32 %v2176_v22 }
 0x9d7   : > { %v2177_v9 = vadd.f32 1e-05, %v2171_v7 }
 0x9d8   : > { %v2164_v10 = vpop.xlane.xlu0 %2163  ;;  %v2200_v50 = vpop.permute.xlu1 %2199 }
 0x9d9   : > { %3123 = vrsqrt.f32 %v2177_v9  ;;  %v2172_v29 = vmul.f32 0.03125, %v2164_v10 }
 0x9db   : > { %v2178_v42 = vadd.f32 1e-05, %v2172_v29 }
 0x9dc   : > { %v2194_v54 = vpop.permute.xlu0 %2193  ;;  %v2207_v37 = vpop.permute.xlu1 %2206 }
 0x9dd   : > { %v2196_v19 = vmul.f32 %v2194_v54, %v2186_v14  ;;  %v2197_v18 = vmul.f32 %v2194_v54, %v2187_v38  ;;  %3125 = vrsqrt.f32 %v2178_v42 }
 0x9df   : > { %v2202_v56 = vadd.f32 %v2200_v50, %v2196_v19  ;;  %v2203_v12 = vadd.f32 %v2200_v50, %v2197_v18 }
 0x9e1   : > { %v2221_v39 = vpack.c.bf16 %v2203_v12, %v2202_v56 }
 0x9e2   : > { %v3122_v33 = vpop.eup %3121 }
 0x9e3   : > { %2978 = vmatmul.mubr.msk.bf16.vlgmr.msra.gmra.mxu1 %vm639_vm2, %v2221_v39  ;;  %v2188_v45 = vmul.f32 %v3122_v33, %v4043_v30 }
 0x9e4   : > { %2981 = vmatprep.mubr.msk.bf16.mxu1 %vm3169_vm4, %v3168_v59 }
 0x9e5   : > { %v2198_v35 = vmul.f32 %v2194_v54, %v2188_v45  ;;  %v2209_v60 = vmul.f32 %v2207_v37, %v2188_v45 }
 0x9e6   : > { %v3124_v31 = vpop.eup %3123 }
 0x9e7   : > { %v2189_v21 = vmul.f32 %v3124_v31, %v4048_v27  ;;  %v2204_v4 = vadd.f32 %v2200_v50, %v2198_v35 }
 0x9e9   : > { %v2210_v46 = vmul.f32 %v2207_v37, %v2189_v21 }
 0x9ea   : > { %v3126_v30 = vpop.eup %3125 }
 0x9eb   : > { %v2190_v27 = vmul.f32 %v3126_v30, %v4054_v47  ;;  %v3055_v47 = vld [vmem:[%s3311_s18 + $0x8] sm:$0xff]  }
 0x9ec   : > { %2994 = vmatpush3.bf16.msra.mxu0 %v3055_v47 }
 0x9ed   : > { %v2211_v20 = vmul.f32 %v2207_v37, %v2190_v27  ;;  %2995 = vmatprep.subr.bf16.mxu0 %v3168_v59 }
 0xa0d   : > { %v2167_v26 = vpop.xlane.xlu1 %2166 }
 0xa0e   : > { %v2173_v63 = vmul.f32 0.03125, %v2167_v26 }
 0xa10   : > { %v2179_v0 = vadd.f32 1e-05, %v2173_v63 }
 0xa11   : > { %v2214_v11 = vpop.permute.xlu1 %2213 }
 0xa12   : > { %3127 = vrsqrt.f32 %v2179_v0  ;;  %v2216_v13 = vadd.f32 %v2214_v11, %v2209_v60  ;;  %v2217_v40 = vadd.f32 %v2214_v11, %v2210_v46  ;;  %v2218_v49 = vadd.f32 %v2214_v11, %v2211_v20 }
 0xa14   : > { %v2220_v36 = vsel %vm759_vm5, %v2204_v4, %v2216_v13 }
 0xa15   : > { %v2222_v61 = vpack.c.bf16 %v2217_v40, %v2220_v36 }
 0xa17   : > { %2982 = vmatmul.mubr.msk.bf16.gmra.mxu1 %vm639_vm2, %v2222_v61 }
 0xa18   : > { %2985 = vmatprep.mubr.msk.bf16.mxu1 %vm3169_vm4, %v3168_v59 }
 0xa1f   : > { %v3128_v2 = vpop.eup %3127 }
 0xa20   : > { %v2191_v28 = vmul.f32 %v3128_v2, %v2143_v24  ;;  %v3056_v24 = vld [vmem:[%s3311_s18] sm:$0xff]  }
 0xa21   : > { %2996 = vmatpush3.bf16.msra.mxu0 %v3056_v24 }
 0xa22   : > { %v2212_v32 = vmul.f32 %v2207_v37, %v2191_v28 }
 0xa24   : > { %v2219_v58 = vadd.f32 %v2214_v11, %v2212_v32 }
 0xa26   : > { %v2223_v17 = vpack.c.bf16 %v2219_v58, %v2218_v49 }
 0xa28   : > { %2986 = vmatmul.mubr.msk.bf16.gmra.mxu1 %vm639_vm2, %v2223_v17 }
 0xaa3   : > { %v2290_v57 = vpop.f32.mrf.mxu1 }
 0xaa4   : > { %v2291_v48 = vadd.f32 %v2788_v53, %v2290_v57 }
 0xaa5   : > { %v2979_v52 = vpop.f32.mrf.mxu1 }
 0xaa6   : > { %v2319_v1 = vmul.f32 %v2291_v48, %v2291_v48  ;;  %v2313_v39 = vmul.f32 0.5, %v2291_v48 }
 0xaa7   : > { %v2293_v25 = vpop.f32.mrf.mxu1 }
 0xaa8   : > { %v2325_v5 = vmul.f32 %v2319_v1, %v2291_v48  ;;  %v2294_v23 = vadd.f32 %v2788_v53, %v2293_v25 }
 0xaa9   : > { %v2980_v15 = vpop.f32.mrf.mxu1 }
 0xaaa   : > { %v2331_v51 = vmul.f32 0.044715, %v2325_v5  ;;  %v2320_v55 = vmul.f32 %v2294_v23, %v2294_v23  ;;  %v2314_v3 = vmul.f32 0.5, %v2294_v23 }
 0xaac   : > { %v2337_v10 = vadd.f32 %v2331_v51, %v2291_v48  ;;  %v2326_v14 = vmul.f32 %v2320_v55, %v2294_v23 }
 0xaae   : > { %v2343_v38 = vmul.f32 0.7978846, %v2337_v10  ;;  %v2332_v54 = vmul.f32 0.044715, %v2326_v14 }
 0xab0   : > { %3129 = vtanh.f32 %v2343_v38  ;;  %v2338_v19 = vadd.f32 %v2332_v54, %v2294_v23 }
 0xab2   : > { %v2344_v18 = vmul.f32 0.7978846, %v2338_v19 }
 0xab4   : > { %3131 = vtanh.f32 %v2344_v18 }
 0xabd   : > { %v3130_v50 = vpop.eup %3129 }
 0xabe   : > { %v2355_v56 = vadd.f32 1.0, %v3130_v50 }
 0xac0   : > { %v2361_v22 = vmul.f32 %v2355_v56, %v2313_v39  ;;  %v2801_v39 = vld [vmem:[%s612_s13] ss:$0 sm:$0xff]  ;;  %s4209_s13 = sld [smem:[#allocation7_spill]] (!%p2802_p5) }
 0xac1   : > { %v3132_v12 = vpop.eup %3131 }
 0xac2   : > { %v2356_v7 = vadd.f32 1.0, %v3132_v12 }
 0xac4   : > { %v2362_v9 = vmul.f32 %v2356_v7, %v2314_v3 }
 0xac6   : > { %v2367_v29 = vpack.c.bf16 %v2362_v9, %v2361_v22 }
 0xac8   : > { %2998 = vmatmul.mubr.msk.bf16.vlgmr.msra.gmra.mxu0 %vm2402_vm13, %v2367_v29 }
 0xac9   : > { %3001 = vmatprep.mubr.msk.bf16.mxu0 %vm3169_vm4, %v3168_v59 }
 0xad7   : > { %v2298_v33 = vpop.f32.mrf.mxu1 }
 0xad8   : > { %v2299_v31 = vadd.f32 %v2788_v53, %v2298_v33 }
 0xad9   : > { %v2983_v37 = vpop.f32.mrf.mxu1 }
 0xada   : > { %v2321_v42 = vmul.f32 %v2299_v31, %v2299_v31  ;;  %v2315_v1 = vmul.f32 0.5, %v2299_v31 }
 0xadb   : > { %v2301_v45 = vpop.f32.mrf.mxu1 }
 0xadc   : > { %v2327_v21 = vmul.f32 %v2321_v42, %v2299_v31  ;;  %v2302_v26 = vadd.f32 %v2788_v53, %v2301_v45 }
 0xadd   : > { %v2984_v35 = vpop.f32.mrf.mxu1 }
 0xade   : > { %v2333_v63 = vmul.f32 0.044715, %v2327_v21  ;;  %v2322_v0 = vmul.f32 %v2302_v26, %v2302_v26  ;;  %v2316_v25 = vmul.f32 0.5, %v2302_v26 }
 0xae0   : > { %v2339_v46 = vadd.f32 %v2333_v63, %v2299_v31  ;;  %v2328_v60 = vmul.f32 %v2322_v0, %v2302_v26 }
 0xae2   : > { %v2345_v11 = vmul.f32 0.7978846, %v2339_v46  ;;  %v2334_v4 = vmul.f32 0.044715, %v2328_v60 }
 0xae4   : > { %3133 = vtanh.f32 %v2345_v11  ;;  %v2340_v13 = vadd.f32 %v2334_v4, %v2302_v26 }
 0xae6   : > { %v2346_v40 = vmul.f32 0.7978846, %v2340_v13 }
 0xae8   : > { %3135 = vtanh.f32 %v2346_v40  ;;  %v2306_v36 = vpop.f32.mrf.mxu1 }
 0xae9   : > { %v2307_v61 = vadd.f32 %v2788_v53, %v2306_v36 }
 0xaea   : > { %v2987_v30 = vpop.f32.mrf.mxu1 }
 0xaeb   : > { %v2323_v27 = vmul.f32 %v2307_v61, %v2307_v61  ;;  %v2317_v38 = vmul.f32 0.5, %v2307_v61 }
 0xaec   : > { %v2309_v2 = vpop.f32.mrf.mxu1 }
 0xaed   : > { %v2329_v28 = vmul.f32 %v2323_v27, %v2307_v61  ;;  %v2310_v32 = vadd.f32 %v2788_v53, %v2309_v2 }
 0xaee   : > { %v2988_v20 = vpop.f32.mrf.mxu1 }
 0xaef   : > { %v2335_v49 = vmul.f32 0.044715, %v2329_v28  ;;  %v2324_v58 = vmul.f32 %v2310_v32, %v2310_v32  ;;  %v2318_v54 = vmul.f32 0.5, %v2310_v32 }
 0xaf1   : > { %v3134_v17 = vpop.eup %3133  ;;  %v2341_v6 = vadd.f32 %v2335_v49, %v2307_v61  ;;  %v2330_v34 = vmul.f32 %v2324_v58, %v2310_v32 }
 0xaf2   : > { %v2357_v57 = vadd.f32 1.0, %v3134_v17 }
 0xaf3   : > { %v2347_v47 = vmul.f32 0.7978846, %v2341_v6  ;;  %v2336_v24 = vmul.f32 0.044715, %v2330_v34 }
 0xaf4   : > { %v2363_v15 = vmul.f32 %v2357_v57, %v2315_v1 }
 0xaf5   : > { %v3136_v48 = vpop.eup %3135  ;;  %3137 = vtanh.f32 %v2347_v47  ;;  %v2342_v52 = vadd.f32 %v2336_v24, %v2310_v32 }
 0xaf6   : > { %v2358_v5 = vadd.f32 1.0, %v3136_v48 }
 0xaf7   : > { %v2348_v23 = vmul.f32 0.7978846, %v2342_v52 }
 0xaf8   : > { %v2364_v51 = vmul.f32 %v2358_v5, %v2316_v25 }
 0xaf9   : > { %3139 = vtanh.f32 %v2348_v23 }
 0xafa   : > { %v2368_v53 = vpack.c.bf16 %v2364_v51, %v2363_v15 }
 0xafc   : > { %3002 = vmatmul.mubr.msk.bf16.gmra.mxu0 %vm2402_vm13, %v2368_v53 }
 0xafd   : > { %3005 = vmatprep.mubr.msk.bf16.mxu0 %vm3169_vm4, %v3168_v59 }
 0xb02   : > { %v3138_v55 = vpop.eup %3137 }
 0xb03   : > { %v2359_v10 = vadd.f32 1.0, %v3138_v55 }
 0xb05   : > { %v2365_v18 = vmul.f32 %v2359_v10, %v2317_v38 }
 0xb06   : > { %v3140_v14 = vpop.eup %3139 }
 0xb07   : > { %v2360_v19 = vadd.f32 1.0, %v3140_v14 }
 0xb09   : > { %v2366_v50 = vmul.f32 %v2360_v19, %v2318_v54 }
 0xb0b   : > { %v2369_v56 = vpack.c.bf16 %v2366_v50, %v2365_v18 }
 0xb0d   : > { %3006 = vmatmul.mubr.msk.bf16.gmra.mxu0 %vm2402_vm13, %v2369_v56 }
 0xb88   : > { %v2446_v12 = vpop.f32.mrf.mxu0 }
 0xb89   : > { %v2469_v3 = vadd.f32 %v2446_v12, %v4014_v43 }
 0xb8a   : > { %v2999_v59 = vpop.f32.mrf.mxu0 }
 0xb8b   : > { %v2482_v7 = vadd.f32 %v2801_v39, %v2469_v3 }
 0xb8c   : > { %v2449_v22 = vpop.f32.mrf.mxu0 }
 0xb8d   : > { %2488 = vst.msk [vmem:[#allocation2] sm:$0xff] %vm639_vm2, %v2482_v7  ;;  %v2470_v9 = vadd.f32 %v2449_v22, %v4018_v62 }
 0xb8e   : > { %v3000_v29 = vpop.f32.mrf.mxu0 }
 0xb8f   : > { %v2483_v33 = vadd.f32 %v2801_v39, %v2470_v9 }
 0xb91   : > { %2489 = vst.msk [vmem:[#allocation2 + $0x8] sm:$0xff] %vm639_vm2, %v2483_v33 }
 0xbbc   : > { %v2454_v31 = vpop.f32.mrf.mxu0 }
 0xbbd   : > { %v2471_v37 = vadd.f32 %v2454_v31, %v4022_v8 }
 0xbbe   : > { %v3003_v42 = vpop.f32.mrf.mxu0 }
 0xbbf   : > { %v2484_v45 = vadd.f32 %v2801_v39, %v2471_v37 }
 0xbc0   : > { %v2457_v21 = vpop.f32.mrf.mxu0 }
 0xbc1   : > { %2490 = vst.msk [vmem:[#allocation2 + $0x10] sm:$0xff] %vm639_vm2, %v2484_v45  ;;  %v2472_v43 = vadd.f32 %v2457_v21, %v4026_v16 }
 0xbc2   : > { %v3004_v26 = vpop.f32.mrf.mxu0 }
 0xbc3   : > { %v2485_v35 = vadd.f32 %v2801_v39, %v2472_v43 }
 0xbc5   : > { %2491 = vst.msk [vmem:[#allocation2 + $0x18] sm:$0xff] %vm639_vm2, %v2485_v35 }
 0xbcd   : > { %v2462_v63 = vpop.f32.mrf.mxu0 }
 0xbce   : > { %v2473_v62 = vadd.f32 %v2462_v63, %v4030_v41 }
 0xbcf   : > { %v3007_v0 = vpop.f32.mrf.mxu0 }
 0xbd0   : > { %v2486_v46 = vadd.f32 %v2801_v39, %v2473_v62 }
 0xbd1   : > { %v2465_v60 = vpop.f32.mrf.mxu0 }
 0xbd2   : > { %2492 = vst.msk [vmem:[#allocation2 + $0x20] sm:$0xff] %vm639_vm2, %v2486_v46  ;;  %v2474_v8 = vadd.f32 %v2465_v60, %v4034_v44  ;;  %2497 = sbr.rel (%p2802_p5) target bundleno = 3354 (0xd1a), region = 88 }
 0xbd3   : > { %v3008_v11 = vpop.f32.mrf.mxu0 }
 0xbd4   : > { %v2487_v4 = vadd.f32 %v2801_v39, %v2474_v8 }
 0xbd6   : > { %2493 = vst.msk [vmem:[#allocation2 + $0x28] sm:$0x3] %vm655_vm3, %v2487_v4 }
 0xbd7   : > { %v2498_v16 = vsel %vm639_vm2, %v2482_v7, 0.0  ;;  %v2504_v13 = vsel %vm639_vm2, %v2484_v45, 0.0  ;;  %v2501_v41 = vsel %vm639_vm2, %v2483_v33, 0.0  ;;  %v2507_v40 = vsel %vm639_vm2, %v2485_v35, 0.0  ;;  %v2804_v62 = vld [vmem:[%s4210_s26] ss:$0 sm:$0xff] }
 0xbd8   : > { %2499 = vadd.xlane.f32.xlu0 %v2498_v16  ;;  %2505 = vadd.xlane.f32.xlu1 %v2504_v13  ;;  %v2510_v44 = vsel %vm639_vm2, %v2486_v46, 0.0  ;;  %v2513_v36 = vsel %vm655_vm3, %v2487_v4, 0.0  ;;  %vm2626_vm14 = vcmask 257024   ;;  %vm2632_vm15 = vcmask 253952  }
 0xbdc   : > { %2502 = vadd.xlane.f32.xlu0 %v2501_v41  ;;  %2508 = vadd.xlane.f32.xlu1 %v2507_v40 }
 0xbe0   : > { %2511 = vadd.xlane.f32.xlu0 %v2510_v44  ;;  %2514 = vadd.xlane.f32.xlu1 %v2513_v36 }
 0xc61   : > { %v2500_v61 = vpop.xlane.xlu0 %2499  ;;  %v2506_v30 = vpop.xlane.xlu1 %2505 }
 0xc62   : > { %v2516_v27 = vmul.f32 0.03125, %v2500_v61  ;;  %v2518_v2 = vmul.f32 0.03125, %v2506_v30 }
 0xc64   : > { %v2522_v28 = vsub.f32 %v2482_v7, %v2516_v27  ;;  %v4127_v32 = vsub.f32 %v2484_v45, %v2518_v2 }
 0xc65   : > { %v2503_v20 = vpop.xlane.xlu0 %2502  ;;  %v2509_v49 = vpop.xlane.xlu1 %2508 }
 0xc66   : > { %v2517_v58 = vmul.f32 0.03125, %v2503_v20  ;;  %v2519_v17 = vmul.f32 0.03125, %v2509_v49  ;;  %v2528_v6 = vmul.f32 %v2522_v28, %v2522_v28  ;;  %v2530_v34 = vmul.f32 %v4127_v32, %v4127_v32 }
 0xc68   : > { %v2523_v47 = vsub.f32 %v2483_v33, %v2517_v58  ;;  %v4131_v24 = vsub.f32 %v2485_v35, %v2519_v17  ;;  %v2534_v57 = vsel %vm639_vm2, %v2528_v6, 0.0  ;;  %v2540_v1 = vsel %vm639_vm2, %v2530_v34, 0.0  ;;  %v2803_v35 = vld [vmem:[%s4209_s13] ss:$0 sm:$0xff] }
 0xc69   : > { %2535 = vadd.xlane.f32.xlu0 %v2534_v57  ;;  %v2512_v48 = vpop.xlane.xlu0 %2511  ;;  %v2515_v52 = vpop.xlane.xlu1 %2514 }
 0xc6a   : > { %v2520_v25 = vmul.f32 0.03125, %v2512_v48  ;;  %v2521_v5 = vmul.f32 0.03125, %v2515_v52  ;;  %v2529_v23 = vmul.f32 %v2523_v47, %v2523_v47  ;;  %v2531_v15 = vmul.f32 %v4131_v24, %v4131_v24 }
 0xc6c   : > { %v2526_v51 = vsub.f32 %v2486_v46, %v2520_v25  ;;  %v4137_v53 = vsub.f32 %v2487_v4, %v2521_v5  ;;  %v2537_v55 = vsel %vm639_vm2, %v2529_v23, 0.0  ;;  %v2543_v10 = vsel %vm639_vm2, %v2531_v15, 0.0 }
 0xc6d   : > { %2541 = vadd.xlane.f32.xlu0 %v2540_v1  ;;  %2538 = vadd.xlane.f32.xlu1 %v2537_v55 }
 0xc6e   : > { %v2532_v14 = vmul.f32 %v2526_v51, %v2526_v51  ;;  %v2533_v38 = vmul.f32 %v4137_v53, %v4137_v53 }
 0xc70   : > { %v2546_v54 = vsel %vm639_vm2, %v2532_v14, 0.0  ;;  %v2549_v19 = vsel %vm655_vm3, %v2533_v38, 0.0 }
 0xc71   : > { %2544 = vadd.xlane.f32.xlu1 %v2543_v10  ;;  %2547 = vadd.xlane.f32.xlu0 %v2546_v54 }
 0xc75   : > { %2550 = vadd.xlane.f32.xlu1 %v2549_v19 }
 0xcf2   : > { %v2536_v18 = vpop.xlane.xlu0 %2535 }
 0xcf3   : > { %v2552_v50 = vmul.f32 0.03125, %v2536_v18 }
 0xcf5   : > { %v2558_v56 = vadd.f32 1e-05, %v2552_v50 }
 0xcf6   : > { %v2539_v12 = vpop.xlane.xlu1 %2538  ;;  %v2542_v39 = vpop.xlane.xlu0 %2541 }
 0xcf7   : > { %3147 = vrsqrt.f32 %v2558_v56  ;;  %v2553_v3 = vmul.f32 0.03125, %v2539_v12  ;;  %v2554_v59 = vmul.f32 0.03125, %v2542_v39 }
 0xcf9   : > { %v2559_v7 = vadd.f32 1e-05, %v2553_v3  ;;  %v2560_v22 = vadd.f32 1e-05, %v2554_v59 }
 0xcfa   : > { %v2545_v9 = vpop.xlane.xlu1 %2544  ;;  %v2548_v29 = vpop.xlane.xlu0 %2547 }
 0xcfb   : > { %3149 = vrsqrt.f32 %v2559_v7  ;;  %v2555_v33 = vmul.f32 0.03125, %v2545_v9  ;;  %v2556_v31 = vmul.f32 0.03125, %v2548_v29 }
 0xcfc   : > { %3151 = vrsqrt.f32 %v2560_v22 }
 0xcfd   : > { %v2561_v37 = vadd.f32 1e-05, %v2555_v33  ;;  %v2562_v42 = vadd.f32 1e-05, %v2556_v31 }
 0xcfe   : > { %v2551_v45 = vpop.xlane.xlu1 %2550 }
 0xcff   : > { %3153 = vrsqrt.f32 %v2561_v37  ;;  %v2557_v21 = vmul.f32 0.03125, %v2551_v45 }
 0xd00   : > { %3155 = vrsqrt.f32 %v2562_v42 }
 0xd01   : > { %v2563_v43 = vadd.f32 1e-05, %v2557_v21 }
 0xd03   : > { %3157 = vrsqrt.f32 %v2563_v43 }
 0xd04   : > { %v3148_v26 = vpop.eup %3147 }
 0xd05   : > { %v2570_v63 = vmul.f32 %v3148_v26, %v2522_v28 }
 0xd07   : > { %v2583_v0 = vmul.f32 %v2803_v35, %v2570_v63 }
 0xd08   : > { %v3150_v46 = vpop.eup %3149 }
 0xd09   : > { %v3152_v60 = vpop.eup %3151  ;;  %v2596_v8 = vadd.f32 %v2804_v62, %v2583_v0  ;;  %v2571_v11 = vmul.f32 %v3150_v46, %v2523_v47 }
 0xd0a   : > { %v2572_v4 = vmul.f32 %v3152_v60, %v4127_v32 }
 0xd0b   : > { %v2817_v16 = vpack.c.bf16 %v2596_v8, %v2596_v8  ;;  %v2584_v13 = vmul.f32 %v2803_v35, %v2571_v11 }
 0xd0c   : > { %v3154_v41 = vpop.eup %3153  ;;  %v2585_v40 = vmul.f32 %v2803_v35, %v2572_v4 }
 0xd0d   : > { %v3156_v44 = vpop.eup %3155  ;;  %2627 = vst.msk [vmem:[%s4211_s22] sm:$0xf] %vm2626_vm14, %v2817_v16  ;;  %v2597_v36 = vadd.f32 %v2804_v62, %v2584_v13  ;;  %v2573_v61 = vmul.f32 %v3154_v41, %v4131_v24 }
 0xd0e   : > { %v2598_v30 = vadd.f32 %v2804_v62, %v2585_v40  ;;  %v2574_v27 = vmul.f32 %v3156_v44, %v2526_v51 }
 0xd0f   : > { %v2818_v2 = vpack.c.bf16 %v2597_v36, %v2597_v36  ;;  %v2586_v28 = vmul.f32 %v2803_v35, %v2573_v61 }
 0xd10   : > { %v3158_v20 = vpop.eup %3157  ;;  %v2819_v49 = vpack.c.bf16 %v2598_v30, %v2598_v30  ;;  %v2587_v32 = vmul.f32 %v2803_v35, %v2574_v27 }
 0xd11   : > { %2628 = vst.msk [vmem:[%s4211_s22 + $0x4] sm:$0xf] %vm2626_vm14, %v2818_v2  ;;  %v2599_v58 = vadd.f32 %v2804_v62, %v2586_v28  ;;  %v2575_v17 = vmul.f32 %v3158_v20, %v4137_v53 }
 0xd12   : > { %2629 = vst.msk [vmem:[%s4211_s22 + $0x8] sm:$0xf] %vm2626_vm14, %v2819_v49  ;;  %v2600_v6 = vadd.f32 %v2804_v62, %v2587_v32 }
 0xd13   : > { %v2820_v34 = vpack.c.bf16 %v2599_v58, %v2599_v58  ;;  %v2588_v47 = vmul.f32 %v2803_v35, %v2575_v17 }
 0xd14   : > { %v2821_v24 = vpack.c.bf16 %v2600_v6, %v2600_v6 }
 0xd15   : > { %2630 = vst.msk [vmem:[%s4211_s22 + $0xc] sm:$0xf] %vm2626_vm14, %v2820_v34  ;;  %v2601_v57 = vadd.f32 %v2804_v62, %v2588_v47 }
 0xd16   : > { %2631 = vst.msk [vmem:[%s4211_s22 + $0x10] sm:$0xf] %vm2626_vm14, %v2821_v24 }
 0xd17   : > { %v2822_v48 = vpack.c.bf16 %v2601_v57, %v2601_v57 }
 0xd19   : > { %2633 = vst.msk [vmem:[%s4211_s22 + $0x14] sm:$0x1] %vm2632_vm15, %v2822_v48 }
 0xd1a PF: > { %s4212_s5 = sld [smem:[#allocation3_spill]] }
 0xd20   : > { %s25_s18 = sadd.s32 1, %s4212_s5  }
 0xd21   : > { %p22_p6 = scmp.ge.s32.totalorder %s25_s18, 4  }
 0xd23   :  { %24 = sbr.rel (!%p22_p6) target bundleno = 7 (0x7), region = 138 }

</bundles_post_ra>
